<compile_context>
chip_gen: v5e
topology: v5e:2x2
jax: 0.10.0
libtpu: 0.0.40
codegen_flags: <defaults>
</compile_context>

<pallas_src>
import functools
import numpy as np
import jax
import jax.numpy as jnp
from jax.experimental import pallas as pl
from jax.experimental.pallas import tpu as pltpu


# ----------------------------------------------------------------------------
# Pallas kernel: one (k-space tile, image-row tile) step of the forward op.
# ----------------------------------------------------------------------------
def _subspace_sense_fwd_kernel(ab_ref, r0_ref, r1_ref, trjT_ref, w_ref,
                               out_ref, e1r_ref, e1i_ref, acc_p_ref, acc_q_ref,
                               *, ab_resident):
    hw = pl.program_id(1)
    n_hw = pl.num_programs(1)
    n_rows = r0_ref.shape[0]              # image rows covered by this hw tile
    W = r1_ref.shape[0]                   # image width (columns)
    t_hw = n_rows * W
    t_k = acc_p_ref.shape[1]
    neg_two_pi = -2.0 * np.pi

    # ---- per-k-space-tile init: zero accumulators and build the column
    #      factor E1[col, t] = exp(-2*pi*i * r1[col] * trj1[t]) ONCE per kt.
    @pl.when(hw == 0)
    def _():
        acc_p_ref[...] = jnp.zeros_like(acc_p_ref)
        acc_q_ref[...] = jnp.zeros_like(acc_q_ref)
        d1 = r1_ref[...] * trjT_ref[1:2, :]            # (W,1)*(1,t_k) outer
        d1 = d1 - jnp.floor(d1 + 0.5)                  # mod-1 (cycles), f32
        ph1 = neg_two_pi * d1
        e1r_ref[...] = jnp.cos(ph1)
        e1i_ref[...] = jnp.sin(ph1)

    # ---- per-step row factor E0[row, t]: only 2*n_rows*t_k transcendentals
    d0 = r0_ref[...] * trjT_ref[0:1, :]                # (n_rows,1)*(1,t_k)
    d0 = d0 - jnp.floor(d0 + 0.5)                      # mod-1 range reduction
    ph0 = neg_two_pi * d0
    e0r = jnp.cos(ph0)                                 # (n_rows, t_k)
    e0i = jnp.sin(ph0)
    e1r = e1r_ref[...]                                 # (W, t_k)
    e1i = e1i_ref[...]

    # ---- stacked [Re; Im] spatial weights for this image-row tile
    if ab_resident:
        col0 = pl.multiple_of(hw * t_hw, t_hw)         # aligned lane slice
        ab = ab_ref[:, pl.ds(col0, t_hw)]              # resident: slice VMEM
    else:
        ab = ab_ref[...]                               # streamed (2M, t_hw)

    # ---- separable E-tile build (VPU complex multiply, sublane broadcast)
    #      + MXU accumulate.  er -> dot, then ei -> dot bounds vreg pressure.
    er = (e0r[:, None, :] * e1r[None, :, :]
          - e0i[:, None, :] * e1i[None, :, :]).reshape(t_hw, t_k)
    acc_p_ref[...] += jnp.dot(ab, er, preferred_element_type=jnp.float32)
    ei = (e0r[:, None, :] * e1i[None, :, :]
          + e0i[:, None, :] * e1r[None, :, :]).reshape(t_hw, t_k)
    acc_q_ref[...] += jnp.dot(ab, ei, preferred_element_type=jnp.float32)

    # ---- epilogue: complex recombine, temporal/subspace weighting, rank sum
    @pl.when(hw == n_hw - 1)
    def _():
        M = acc_p_ref.shape[0] // 2
        nc = out_ref.shape[0] // 2
        R = w_ref.shape[1]                     # combined rank = Ksub * L
        P = acc_p_ref[...]
        Q = acc_q_ref[...]
        cr = P[:M] - Q[M:]                     # Re(A @ E)   (M, t_k)
        ci = Q[:M] + P[M:]                     # Im(A @ E)
        wr = w_ref[0]                          # (R, t_k)
        wi = w_ref[1]
        kr = jnp.zeros((nc, t_k), jnp.float32)
        ki = jnp.zeros((nc, t_k), jnp.float32)
        for r in range(R):                     # small static rank unroll
            crr = cr[r * nc:(r + 1) * nc]      # (nc, t_k)
            cir = ci[r * nc:(r + 1) * nc]
            wrr = wr[r:r + 1]                  # (1, t_k)
            wir = wi[r:r + 1]
            kr = kr + crr * wrr - cir * wir
            ki = ki + crr * wir + cir * wrr
        out_ref[0:nc, :] = kr
        out_ref[nc:, :] = ki


# ----------------------------------------------------------------------------
# Wrapper (setup / glue: stacking, weights, tiling, VMEM plan, pallas_call)
# ----------------------------------------------------------------------------
def subspace_linop_new_forward(alphas, phi, mps, spatial_funcs, temporal_funcs,
                               trj, *, t_hw=128, t_k=128,
                               core_parallel_kt=False):
    """alphas:(Ksub,H,W) c64, phi:(Ksub,T) c64, mps:(nc,H,W) c64,
    spatial_funcs:(L,H,W) c64, temporal_funcs:(L,T) c64,
    trj:(T,2) f32 with values in [-n/2, n/2].  Returns ksp:(nc,T) complex64.

    t_hw must be a whole number of image rows (multiple of W); on v6e/v7x use
    256-multiples of both tiles for bigger problems.  core_parallel_kt=True
    shards the independent kt tiles across the two v7x TensorCores."""
    Ksub, H, W = alphas.shape
    nc = mps.shape[0]
    L = spatial_funcs.shape[0]
    T, ndim = trj.shape
    HW = H * W
    R = Ksub * L
    M = R * nc
    f32 = jnp.float32

    # TODO(synk): separable-grid fast path is written for 2-D im_size only.
    assert ndim == 2
    assert phi.shape == (Ksub, T) and temporal_funcs.shape == (L, T)
    assert W % 8 == 0, "W must be a multiple of 8 (sublane-aligned E tile)"
    assert t_hw % W == 0 and HW % t_hw == 0
    n_rows = t_hw // W
    assert H % n_rows == 0 and (n_rows % 8 == 0 or n_rows == H)
    assert t_hw % 128 == 0 or t_hw == HW
    assert T % t_k == 0 and (t_k % 128 == 0 or t_k == T)

    # Combined spatial weights A[(k*L+l)*nc + c, x] = alphas[k]*sf[l]*mps[c],
    # stacked [Re; Im] -> a single (2M, HW) MXU LHS.
    SB = (alphas.reshape(Ksub, 1, 1, HW)
          * spatial_funcs.reshape(1, L, 1, HW)
          * mps.reshape(1, 1, nc, HW)).reshape(M, HW).astype(jnp.complex64)
    ab_stack = jnp.concatenate([SB.real.astype(f32), SB.imag.astype(f32)],
                               axis=0)                                # (2M, HW)

    # Combined temporal weights W[k*L+l, t] = phi[k,t] * temporal_funcs[l,t],
    # [Re, Im] stacked along a leading axis -> one input / one DMA per tile.
    Wc = (phi.reshape(Ksub, 1, T) * temporal_funcs.reshape(1, L, T)
          ).reshape(R, T).astype(jnp.complex64)
    w_stack = jnp.stack([Wc.real.astype(f32), Wc.imag.astype(f32)], axis=0)

    # Separable, normalized image-grid coordinates (cycles) per axis.
    r0 = ((jnp.arange(H, dtype=f32) - H // 2) / H).reshape(H, 1)
    r1 = ((jnp.arange(W, dtype=f32) - W // 2) / W).reshape(W, 1)
    trjT = trj.astype(f32).T                                          # (2, T)

    grid = (T // t_k, HW // t_hw)   # kt outer ("parallel"), HW reduction last

    # ---- VMEM plan: keep ab resident (one DMA total) when it fits; otherwise
    #      stream it per tile (then raise t_k to cut the re-stream passes).
    ab_bytes = 2 * M * HW * 4
    ab_resident = ab_bytes <= (20 << 20)    # leaves headroom on v7x (64 MiB)
    if ab_resident:
        ab_spec = pl.BlockSpec((2 * M, HW), lambda kt, hw: (0, 0))
        ab_vmem = ab_bytes
    else:
        ab_spec = pl.BlockSpec((2 * M, t_hw), lambda kt, hw: (0, hw))
        ab_vmem = 2 * (2 * M * t_hw) * 4    # double-buffered streamed tile

    scratch_vmem = (2 * W * t_k + 2 * (2 * M) * t_k) * 4
    stream_vmem = 2 * (H + W + 2 * t_k + 2 * R * t_k + 2 * nc * t_k) * 4
    etile_vmem = 2 * t_hw * t_k * 4         # er/ei staging headroom
    vmem_need = ab_vmem + scratch_vmem + stream_vmem + etile_vmem
    vmem_limit = int(min(max(2 * vmem_need + (8 << 20), 24 << 20), 40 << 20))
    if vmem_need + (4 << 20) > vmem_limit:  # big-tile plans (v5e/v6e, 128 MiB)
        vmem_limit = int(vmem_need + (8 << 20))

    kt_sem = pltpu.CORE_PARALLEL if core_parallel_kt else "parallel"

    cost = pl.CostEstimate(
        flops=8 * M * HW * T + 8 * HW * T,
        transcendentals=2 * (H + W) * T,
        bytes_accessed=(ab_bytes * (1 if ab_resident else T // t_k)
                        + int(w_stack.size) * 4 + int(trjT.size) * 4
                        + (H + W) * 4 + 2 * nc * T * 4))

    kernel = functools.partial(_subspace_sense_fwd_kernel,
                               ab_resident=ab_resident)

    out = pl.pallas_call(
        kernel,
        out_shape=jax.ShapeDtypeStruct((2 * nc, T), f32),
        grid=grid,
        in_specs=[
            ab_spec,                                               # stacked SBx
            pl.BlockSpec((n_rows, 1), lambda kt, hw: (hw, 0)),     # row coords
            pl.BlockSpec((W, 1), lambda kt, hw: (0, 0)),           # col coords
            pl.BlockSpec((2, t_k), lambda kt, hw: (0, kt)),        # trj tile
            pl.BlockSpec((2, R, t_k), lambda kt, hw: (0, 0, kt)),  # W [Re,Im]
        ],
        out_specs=pl.BlockSpec((2 * nc, t_k), lambda kt, hw: (0, kt)),
        scratch_shapes=[pltpu.VMEM((W, t_k), f32),       # E1 real (per kt)
                        pltpu.VMEM((W, t_k), f32),       # E1 imag (per kt)
                        pltpu.VMEM((2 * M, t_k), f32),   # acc P = A_stack @ er
                        pltpu.VMEM((2 * M, t_k), f32)],  # acc Q = A_stack @ ei
        compiler_params=pltpu.CompilerParams(
            dimension_semantics=(kt_sem, "arbitrary"),
            vmem_limit_bytes=vmem_limit),
        cost_estimate=cost,
    )(ab_stack, r0, r1, trjT, w_stack)

    return (out[:nc] + 1j * out[nc:]).astype(jnp.complex64)


# ----------------------------------------------------------------------------
# Pure-JAX reference (literal module semantics, complex arithmetic)
# ----------------------------------------------------------------------------
def _reference_forward(alphas, phi, mps, spatial_funcs, temporal_funcs, trj):
    Ksub, H, W = alphas.shape
    nc = mps.shape[0]
    L = spatial_funcs.shape[0]
    HW = H * W
    T = trj.shape[0]
    f32 = jnp.float32
    r0 = (jnp.arange(H, dtype=f32) - H // 2) / H
    r1 = (jnp.arange(W, dtype=f32) - W // 2) / W
    g0, g1 = jnp.meshgrid(r0, r1, indexing="ij")
    coords = jnp.stack([g0.ravel(), g1.ravel()], axis=-1)
    E = jnp.exp(-2j * jnp.pi * (coords @ trj.astype(f32).T)
                ).astype(jnp.complex64)                               # (HW, T)
    SB = (alphas.reshape(Ksub, 1, 1, HW)
          * spatial_funcs.reshape(1, L, 1, HW)
          * mps.reshape(1, 1, nc, HW)).astype(jnp.complex64)          # (K,L,c,HW)
    F = jnp.einsum("klcx,xt->klct", SB, E)                            # (K,L,c,T)
    Wfull = (phi.reshape(Ksub, 1, T)
             * temporal_funcs.reshape(1, L, T)).astype(jnp.complex64)
    return jnp.einsum("klct,klt->ct", F, Wfull).astype(jnp.complex64)  # (c, T)


if __name__ == "__main__":
    key = jax.random.PRNGKey(0)
    H = W = 16          # im_size
    nc = 4              # coils
    L = 2               # imperfection rank
    Ksub = 3            # subspace rank (phi: (Ksub, T))
    T = 256             # trajectory samples (trj_size = (T,))

    ks = jax.random.split(key, 12)

    def crandn(k1, k2, shape):
        return (jax.random.normal(k1, shape) +
                1j * jax.random.normal(k2, shape)).astype(jnp.complex64)

    alphas = crandn(ks[0], ks[1], (Ksub, H, W))          # subspace coeff vols
    mps = crandn(ks[2], ks[3], (nc, H, W))
    spatial_funcs = crandn(ks[4], ks[5], (L, H, W))
    temporal_funcs = crandn(ks[6], ks[7], (L, T))
    phi = crandn(ks[8], ks[9], (Ksub, T))
    trj = jax.random.uniform(ks[10], (T, 2),
                             minval=-H / 2.0, maxval=H / 2.0).astype(jnp.float32)

    ksp = subspace_linop_new_forward(alphas, phi, mps, spatial_funcs,
                                     temporal_funcs, trj, t_hw=128, t_k=128)
    ksp = jax.block_until_ready(ksp)

    ksp_ref = _reference_forward(alphas, phi, mps, spatial_funcs,
                                 temporal_funcs, trj)
    np.testing.assert_allclose(np.asarray(ksp), np.asarray(ksp_ref),
                               rtol=2e-2, atol=2e-2)
    assert ksp.shape == (nc, T) and ksp.dtype == jnp.complex64
    print("KERNEL_OK")
</pallas_src>

<mosaic_0001>
module attributes {stable_mosaic.version = 11 : i64} {
  func.func @_subspace_sense_fwd_kernel(%arg0: i32, %arg1: i32, %arg2: memref<48x256xf32, #tpu.memory_space<vmem>>, %arg3: memref<8x1xf32, #tpu.memory_space<vmem>>, %arg4: memref<16x1xf32, #tpu.memory_space<vmem>>, %arg5: memref<2x128xf32, #tpu.memory_space<vmem>>, %arg6: memref<2x6x128xf32, #tpu.memory_space<vmem>>, %arg7: memref<8x128xf32, #tpu.memory_space<vmem>>, %arg8: memref<16x128xf32, #tpu.memory_space<vmem>>, %arg9: memref<16x128xf32, #tpu.memory_space<vmem>>, %arg10: memref<48x128xf32, #tpu.memory_space<vmem>>, %arg11: memref<48x128xf32, #tpu.memory_space<vmem>>) attributes {dimension_semantics = [#tpu.dimension_semantics<parallel>, #tpu.dimension_semantics<arbitrary>], iteration_bounds = array<i64: 2, 2>, scalar_prefetch = 0 : i64, scratch_operands = 4 : i64, tpu.core_type = #tpu.core_type<tc>, window_params = [{pipeline_mode = #tpu.pipeline_mode<synchronous>, transform_indices = @transform_0, window_bounds = array<i64: 48, 256>}, {transform_indices = @transform_1, window_bounds = array<i64: 8, 1>}, {pipeline_mode = #tpu.pipeline_mode<synchronous>, transform_indices = @transform_2, window_bounds = array<i64: 16, 1>}, {transform_indices = @transform_3, window_bounds = array<i64: 2, 128>}, {transform_indices = @transform_4, window_bounds = array<i64: 2, 6, 128>}, {transform_indices = @transform_5, window_bounds = array<i64: 8, 128>}]} {
    %c0_i32 = arith.constant 0 : i32
    %0 = arith.cmpi eq, %arg1, %c0_i32 : i32
    %1 = arith.extui %0 : i1 to i32
    %c0_i32_0 = arith.constant 0 : i32
    %2 = arith.cmpi ne, %1, %c0_i32_0 : i32
    scf.if %2 {
      %cst_21 = arith.constant 0.000000e+00 : f32
      %57 = vector.broadcast %cst_21 : f32 to vector<48x128xf32>
      %c0_22 = arith.constant 0 : index
      %c0_23 = arith.constant 0 : index
      %58 = vector.load %arg10[%c0_22, %c0_23] : memref<48x128xf32, #tpu.memory_space<vmem>>, vector<48x128xf32>
      tpu.vector_store %arg10[%c0_22, %c0_23], %57 {strides = array<i32>} : memref<48x128xf32, #tpu.memory_space<vmem>>, vector<48x128xf32>,
      %cst_24 = arith.constant 0.000000e+00 : f32
      %59 = vector.broadcast %cst_24 : f32 to vector<48x128xf32>
      %c0_25 = arith.constant 0 : index
      %c0_26 = arith.constant 0 : index
      %60 = vector.load %arg11[%c0_25, %c0_26] : memref<48x128xf32, #tpu.memory_space<vmem>>, vector<48x128xf32>
      tpu.vector_store %arg11[%c0_25, %c0_26], %59 {strides = array<i32>} : memref<48x128xf32, #tpu.memory_space<vmem>>, vector<48x128xf32>,
      %c0_27 = arith.constant 0 : index
      %c0_28 = arith.constant 0 : index
      %61 = vector.load %arg4[%c0_27, %c0_28] : memref<16x1xf32, #tpu.memory_space<vmem>>, vector<16x1xf32>
      %c1 = arith.constant 1 : index
      %c0_29 = arith.constant 0 : index
      %62 = vector.load %arg5[%c1, %c0_29] : memref<2x128xf32, #tpu.memory_space<vmem>>, vector<1x128xf32>
      %63 = vector.broadcast %61 : vector<16x1xf32> to vector<16x128xf32>
      %64 = vector.broadcast %62 : vector<1x128xf32> to vector<16x128xf32>
      %65 = arith.mulf %63, %64 : vector<16x128xf32>
      %cst_30 = arith.constant 5.000000e-01 : f32
      %66 = vector.broadcast %cst_30 : f32 to vector<16x128xf32>
      %67 = arith.addf %65, %66 : vector<16x128xf32>
      %68 = math.floor %67 : vector<16x128xf32>
      %69 = arith.subf %65, %68 : vector<16x128xf32>
      %cst_31 = arith.constant -6.28318548 : f32
      %70 = vector.broadcast %cst_31 : f32 to vector<16x128xf32>
      %71 = arith.mulf %70, %69 : vector<16x128xf32>
      %72 = math.cos %71 : vector<16x128xf32>
      %c0_32 = arith.constant 0 : index
      %c0_33 = arith.constant 0 : index
      %73 = vector.load %arg8[%c0_32, %c0_33] : memref<16x128xf32, #tpu.memory_space<vmem>>, vector<16x128xf32>
      tpu.vector_store %arg8[%c0_32, %c0_33], %72 {strides = array<i32>} : memref<16x128xf32, #tpu.memory_space<vmem>>, vector<16x128xf32>,
      %74 = math.sin %71 : vector<16x128xf32>
      %c0_34 = arith.constant 0 : index
      %c0_35 = arith.constant 0 : index
      %75 = vector.load %arg9[%c0_34, %c0_35] : memref<16x128xf32, #tpu.memory_space<vmem>>, vector<16x128xf32>
      tpu.vector_store %arg9[%c0_34, %c0_35], %74 {strides = array<i32>} : memref<16x128xf32, #tpu.memory_space<vmem>>, vector<16x128xf32>,
    } else {
    }
    %c0 = arith.constant 0 : index
    %c0_1 = arith.constant 0 : index
    %3 = vector.load %arg3[%c0, %c0_1] : memref<8x1xf32, #tpu.memory_space<vmem>>, vector<8x1xf32>
    %c0_2 = arith.constant 0 : index
    %c0_3 = arith.constant 0 : index
    %4 = vector.load %arg5[%c0_2, %c0_3] : memref<2x128xf32, #tpu.memory_space<vmem>>, vector<1x128xf32>
    %5 = vector.broadcast %3 : vector<8x1xf32> to vector<8x128xf32>
    %6 = vector.broadcast %4 : vector<1x128xf32> to vector<8x128xf32>
    %7 = arith.mulf %5, %6 : vector<8x128xf32>
    %cst = arith.constant 5.000000e-01 : f32
    %8 = vector.broadcast %cst : f32 to vector<8x128xf32>
    %9 = arith.addf %7, %8 : vector<8x128xf32>
    %10 = math.floor %9 : vector<8x128xf32>
    %11 = arith.subf %7, %10 : vector<8x128xf32>
    %cst_4 = arith.constant -6.28318548 : f32
    %12 = vector.broadcast %cst_4 : f32 to vector<8x128xf32>
    %13 = arith.mulf %12, %11 : vector<8x128xf32>
    %14 = math.cos %13 : vector<8x128xf32>
    %15 = math.sin %13 : vector<8x128xf32>
    %c0_5 = arith.constant 0 : index
    %c0_6 = arith.constant 0 : index
    %16 = vector.load %arg8[%c0_5, %c0_6] : memref<16x128xf32, #tpu.memory_space<vmem>>, vector<16x128xf32>
    %c0_7 = arith.constant 0 : index
    %c0_8 = arith.constant 0 : index
    %17 = vector.load %arg9[%c0_7, %c0_8] : memref<16x128xf32, #tpu.memory_space<vmem>>, vector<16x128xf32>
    %c128_i32 = arith.constant 128 : i32
    %18 = arith.muli %arg1, %c128_i32 : i32
    %19 = tpu.assume_multiple %18, 128 : i32
    %c0_9 = arith.constant 0 : index
    %20 = arith.index_cast %19 : i32 to index
    %21 = vector.load %arg2[%c0_9, %20] : memref<48x256xf32, #tpu.memory_space<vmem>>, vector<48x128xf32>
    %22 = vector.shape_cast %14 : vector<8x128xf32> to vector<8x1x128xf32>
    %23 = vector.shape_cast %16 : vector<16x128xf32> to vector<1x16x128xf32>
    %24 = vector.broadcast %22 : vector<8x1x128xf32> to vector<8x16x128xf32>
    %25 = vector.broadcast %23 : vector<1x16x128xf32> to vector<8x16x128xf32>
    %26 = arith.mulf %24, %25 : vector<8x16x128xf32>
    %27 = vector.shape_cast %15 : vector<8x128xf32> to vector<8x1x128xf32>
    %28 = vector.shape_cast %17 : vector<16x128xf32> to vector<1x16x128xf32>
    %29 = vector.broadcast %27 : vector<8x1x128xf32> to vector<8x16x128xf32>
    %30 = vector.broadcast %28 : vector<1x16x128xf32> to vector<8x16x128xf32>
    %31 = arith.mulf %29, %30 : vector<8x16x128xf32>
    %32 = arith.subf %26, %31 : vector<8x16x128xf32>
    %33 = vector.shape_cast %32 : vector<8x16x128xf32> to vector<128x128xf32>
    %c0_10 = arith.constant 0 : index
    %c0_11 = arith.constant 0 : index
    %34 = vector.load %arg10[%c0_10, %c0_11] : memref<48x128xf32, #tpu.memory_space<vmem>>, vector<48x128xf32>
    %cst_12 = arith.constant dense<0.000000e+00> : vector<48x128xf32>
    %35 = tpu.matmul %21, %33, %cst_12 {dimension_numbers = #tpu.dot_dimension_numbers<[1], [0], [0], [1], [0, 0, 1, 1], [], []>} : vector<48x128xf32>, vector<128x128xf32>, vector<48x128xf32> -> vector<48x128xf32>
    %36 = arith.addf %34, %35 : vector<48x128xf32>
    %c0_13 = arith.constant 0 : index
    %c0_14 = arith.constant 0 : index
    %37 = vector.load %arg10[%c0_13, %c0_14] : memref<48x128xf32, #tpu.memory_space<vmem>>, vector<48x128xf32>
    tpu.vector_store %arg10[%c0_13, %c0_14], %36 {strides = array<i32>} : memref<48x128xf32, #tpu.memory_space<vmem>>, vector<48x128xf32>,
    %38 = vector.shape_cast %14 : vector<8x128xf32> to vector<8x1x128xf32>
    %39 = vector.shape_cast %17 : vector<16x128xf32> to vector<1x16x128xf32>
    %40 = vector.broadcast %38 : vector<8x1x128xf32> to vector<8x16x128xf32>
    %41 = vector.broadcast %39 : vector<1x16x128xf32> to vector<8x16x128xf32>
    %42 = arith.mulf %40, %41 : vector<8x16x128xf32>
    %43 = vector.shape_cast %15 : vector<8x128xf32> to vector<8x1x128xf32>
    %44 = vector.shape_cast %16 : vector<16x128xf32> to vector<1x16x128xf32>
    %45 = vector.broadcast %43 : vector<8x1x128xf32> to vector<8x16x128xf32>
    %46 = vector.broadcast %44 : vector<1x16x128xf32> to vector<8x16x128xf32>
    %47 = arith.mulf %45, %46 : vector<8x16x128xf32>
    %48 = arith.addf %42, %47 : vector<8x16x128xf32>
    %49 = vector.shape_cast %48 : vector<8x16x128xf32> to vector<128x128xf32>
    %c0_15 = arith.constant 0 : index
    %c0_16 = arith.constant 0 : index
    %50 = vector.load %arg11[%c0_15, %c0_16] : memref<48x128xf32, #tpu.memory_space<vmem>>, vector<48x128xf32>
    %cst_17 = arith.constant dense<0.000000e+00> : vector<48x128xf32>
    %51 = tpu.matmul %21, %49, %cst_17 {dimension_numbers = #tpu.dot_dimension_numbers<[1], [0], [0], [1], [0, 0, 1, 1], [], []>} : vector<48x128xf32>, vector<128x128xf32>, vector<48x128xf32> -> vector<48x128xf32>
    %52 = arith.addf %50, %51 : vector<48x128xf32>
    %c0_18 = arith.constant 0 : index
    %c0_19 = arith.constant 0 : index
    %53 = vector.load %arg11[%c0_18, %c0_19] : memref<48x128xf32, #tpu.memory_space<vmem>>, vector<48x128xf32>
    tpu.vector_store %arg11[%c0_18, %c0_19], %52 {strides = array<i32>} : memref<48x128xf32, #tpu.memory_space<vmem>>, vector<48x128xf32>,
    %c1_i32 = arith.constant 1 : i32
    %54 = arith.cmpi eq, %arg1, %c1_i32 : i32
    %55 = arith.extui %54 : i1 to i32
    %c0_i32_20 = arith.constant 0 : i32
    %56 = arith.cmpi ne, %55, %c0_i32_20 : i32
    scf.if %56 {
      %c0_21 = arith.constant 0 : index
      %c0_22 = arith.constant 0 : index
      %57 = vector.load %arg10[%c0_21, %c0_22] : memref<48x128xf32, #tpu.memory_space<vmem>>, vector<48x128xf32>
      %c0_23 = arith.constant 0 : index
      %c0_24 = arith.constant 0 : index
      %58 = vector.load %arg11[%c0_23, %c0_24] : memref<48x128xf32, #tpu.memory_space<vmem>>, vector<48x128xf32>
      %59 = vector.extract_strided_slice %57 {offsets = [0, 0], sizes = [24, 128], strides = [1, 1]} : vector<48x128xf32> to vector<24x128xf32>
      %60 = vector.extract_strided_slice %58 {offsets = [24, 0], sizes = [24, 128], strides = [1, 1]} : vector<48x128xf32> to vector<24x128xf32>
      %61 = arith.subf %59, %60 : vector<24x128xf32>
      %62 = vector.extract_strided_slice %58 {offsets = [0, 0], sizes = [24, 128], strides = [1, 1]} : vector<48x128xf32> to vector<24x128xf32>
      %63 = vector.extract_strided_slice %57 {offsets = [24, 0], sizes = [24, 128], strides = [1, 1]} : vector<48x128xf32> to vector<24x128xf32>
      %64 = arith.addf %62, %63 : vector<24x128xf32>
      %c0_25 = arith.constant 0 : index
      %c0_26 = arith.constant 0 : index
      %c0_27 = arith.constant 0 : index
      %65 = vector.load %arg6[%c0_25, %c0_26, %c0_27] : memref<2x6x128xf32, #tpu.memory_space<vmem>>, vector<1x6x128xf32>
      %66 = vector.shape_cast %65 : vector<1x6x128xf32> to vector<6x128xf32>
      %c1 = arith.constant 1 : index
      %c0_28 = arith.constant 0 : index
      %c0_29 = arith.constant 0 : index
      %67 = vector.load %arg6[%c1, %c0_28, %c0_29] : memref<2x6x128xf32, #tpu.memory_space<vmem>>, vector<1x6x128xf32>
      %68 = vector.shape_cast %67 : vector<1x6x128xf32> to vector<6x128xf32>
      %cst_30 = arith.constant 0.000000e+00 : f32
      %69 = vector.broadcast %cst_30 : f32 to vector<4x128xf32>
      %cst_31 = arith.constant 0.000000e+00 : f32
      %70 = vector.broadcast %cst_31 : f32 to vector<4x128xf32>
      %71 = vector.extract_strided_slice %61 {offsets = [0, 0], sizes = [4, 128], strides = [1, 1]} : vector<24x128xf32> to vector<4x128xf32>
      %72 = vector.extract_strided_slice %64 {offsets = [0, 0], sizes = [4, 128], strides = [1, 1]} : vector<24x128xf32> to vector<4x128xf32>
      %73 = vector.extract_strided_slice %66 {offsets = [0, 0], sizes = [1, 128], strides = [1, 1]} : vector<6x128xf32> to vector<1x128xf32>
      %74 = vector.extract_strided_slice %68 {offsets = [0, 0], sizes = [1, 128], strides = [1, 1]} : vector<6x128xf32> to vector<1x128xf32>
      %75 = vector.broadcast %73 : vector<1x128xf32> to vector<4x128xf32>
      %76 = arith.mulf %71, %75 : vector<4x128xf32>
      %77 = arith.addf %69, %76 : vector<4x128xf32>
      %78 = vector.broadcast %74 : vector<1x128xf32> to vector<4x128xf32>
      %79 = arith.mulf %72, %78 : vector<4x128xf32>
      %80 = arith.subf %77, %79 : vector<4x128xf32>
      %81 = vector.broadcast %74 : vector<1x128xf32> to vector<4x128xf32>
      %82 = arith.mulf %71, %81 : vector<4x128xf32>
      %83 = arith.addf %70, %82 : vector<4x128xf32>
      %84 = vector.broadcast %73 : vector<1x128xf32> to vector<4x128xf32>
      %85 = arith.mulf %72, %84 : vector<4x128xf32>
      %86 = arith.addf %83, %85 : vector<4x128xf32>
      %87 = vector.extract_strided_slice %61 {offsets = [4, 0], sizes = [4, 128], strides = [1, 1]} : vector<24x128xf32> to vector<4x128xf32>
      %88 = vector.extract_strided_slice %64 {offsets = [4, 0], sizes = [4, 128], strides = [1, 1]} : vector<24x128xf32> to vector<4x128xf32>
      %89 = vector.extract_strided_slice %66 {offsets = [1, 0], sizes = [1, 128], strides = [1, 1]} : vector<6x128xf32> to vector<1x128xf32>
      %90 = vector.extract_strided_slice %68 {offsets = [1, 0], sizes = [1, 128], strides = [1, 1]} : vector<6x128xf32> to vector<1x128xf32>
      %91 = vector.broadcast %89 : vector<1x128xf32> to vector<4x128xf32>
      %92 = arith.mulf %87, %91 : vector<4x128xf32>
      %93 = arith.addf %80, %92 : vector<4x128xf32>
      %94 = vector.broadcast %90 : vector<1x128xf32> to vector<4x128xf32>
      %95 = arith.mulf %88, %94 : vector<4x128xf32>
      %96 = arith.subf %93, %95 : vector<4x128xf32>
      %97 = vector.broadcast %90 : vector<1x128xf32> to vector<4x128xf32>
      %98 = arith.mulf %87, %97 : vector<4x128xf32>
      %99 = arith.addf %86, %98 : vector<4x128xf32>
      %100 = vector.broadcast %89 : vector<1x128xf32> to vector<4x128xf32>
      %101 = arith.mulf %88, %100 : vector<4x128xf32>
      %102 = arith.addf %99, %101 : vector<4x128xf32>
      %103 = vector.extract_strided_slice %61 {offsets = [8, 0], sizes = [4, 128], strides = [1, 1]} : vector<24x128xf32> to vector<4x128xf32>
      %104 = vector.extract_strided_slice %64 {offsets = [8, 0], sizes = [4, 128], strides = [1, 1]} : vector<24x128xf32> to vector<4x128xf32>
      %105 = vector.extract_strided_slice %66 {offsets = [2, 0], sizes = [1, 128], strides = [1, 1]} : vector<6x128xf32> to vector<1x128xf32>
      %106 = vector.extract_strided_slice %68 {offsets = [2, 0], sizes = [1, 128], strides = [1, 1]} : vector<6x128xf32> to vector<1x128xf32>
      %107 = vector.broadcast %105 : vector<1x128xf32> to vector<4x128xf32>
      %108 = arith.mulf %103, %107 : vector<4x128xf32>
      %109 = arith.addf %96, %108 : vector<4x128xf32>
      %110 = vector.broadcast %106 : vector<1x128xf32> to vector<4x128xf32>
      %111 = arith.mulf %104, %110 : vector<4x128xf32>
      %112 = arith.subf %109, %111 : vector<4x128xf32>
      %113 = vector.broadcast %106 : vector<1x128xf32> to vector<4x128xf32>
      %114 = arith.mulf %103, %113 : vector<4x128xf32>
      %115 = arith.addf %102, %114 : vector<4x128xf32>
      %116 = vector.broadcast %105 : vector<1x128xf32> to vector<4x128xf32>
      %117 = arith.mulf %104, %116 : vector<4x128xf32>
      %118 = arith.addf %115, %117 : vector<4x128xf32>
      %119 = vector.extract_strided_slice %61 {offsets = [12, 0], sizes = [4, 128], strides = [1, 1]} : vector<24x128xf32> to vector<4x128xf32>
      %120 = vector.extract_strided_slice %64 {offsets = [12, 0], sizes = [4, 128], strides = [1, 1]} : vector<24x128xf32> to vector<4x128xf32>
      %121 = vector.extract_strided_slice %66 {offsets = [3, 0], sizes = [1, 128], strides = [1, 1]} : vector<6x128xf32> to vector<1x128xf32>
      %122 = vector.extract_strided_slice %68 {offsets = [3, 0], sizes = [1, 128], strides = [1, 1]} : vector<6x128xf32> to vector<1x128xf32>
      %123 = vector.broadcast %121 : vector<1x128xf32> to vector<4x128xf32>
      %124 = arith.mulf %119, %123 : vector<4x128xf32>
      %125 = arith.addf %112, %124 : vector<4x128xf32>
      %126 = vector.broadcast %122 : vector<1x128xf32> to vector<4x128xf32>
      %127 = arith.mulf %120, %126 : vector<4x128xf32>
      %128 = arith.subf %125, %127 : vector<4x128xf32>
      %129 = vector.broadcast %122 : vector<1x128xf32> to vector<4x128xf32>
      %130 = arith.mulf %119, %129 : vector<4x128xf32>
      %131 = arith.addf %118, %130 : vector<4x128xf32>
      %132 = vector.broadcast %121 : vector<1x128xf32> to vector<4x128xf32>
      %133 = arith.mulf %120, %132 : vector<4x128xf32>
      %134 = arith.addf %131, %133 : vector<4x128xf32>
      %135 = vector.extract_strided_slice %61 {offsets = [16, 0], sizes = [4, 128], strides = [1, 1]} : vector<24x128xf32> to vector<4x128xf32>
      %136 = vector.extract_strided_slice %64 {offsets = [16, 0], sizes = [4, 128], strides = [1, 1]} : vector<24x128xf32> to vector<4x128xf32>
      %137 = vector.extract_strided_slice %66 {offsets = [4, 0], sizes = [1, 128], strides = [1, 1]} : vector<6x128xf32> to vector<1x128xf32>
      %138 = vector.extract_strided_slice %68 {offsets = [4, 0], sizes = [1, 128], strides = [1, 1]} : vector<6x128xf32> to vector<1x128xf32>
      %139 = vector.broadcast %137 : vector<1x128xf32> to vector<4x128xf32>
      %140 = arith.mulf %135, %139 : vector<4x128xf32>
      %141 = arith.addf %128, %140 : vector<4x128xf32>
      %142 = vector.broadcast %138 : vector<1x128xf32> to vector<4x128xf32>
      %143 = arith.mulf %136, %142 : vector<4x128xf32>
      %144 = arith.subf %141, %143 : vector<4x128xf32>
      %145 = vector.broadcast %138 : vector<1x128xf32> to vector<4x128xf32>
      %146 = arith.mulf %135, %145 : vector<4x128xf32>
      %147 = arith.addf %134, %146 : vector<4x128xf32>
      %148 = vector.broadcast %137 : vector<1x128xf32> to vector<4x128xf32>
      %149 = arith.mulf %136, %148 : vector<4x128xf32>
      %150 = arith.addf %147, %149 : vector<4x128xf32>
      %151 = vector.extract_strided_slice %61 {offsets = [20, 0], sizes = [4, 128], strides = [1, 1]} : vector<24x128xf32> to vector<4x128xf32>
      %152 = vector.extract_strided_slice %64 {offsets = [20, 0], sizes = [4, 128], strides = [1, 1]} : vector<24x128xf32> to vector<4x128xf32>
      %153 = vector.extract_strided_slice %66 {offsets = [5, 0], sizes = [1, 128], strides = [1, 1]} : vector<6x128xf32> to vector<1x128xf32>
      %154 = vector.extract_strided_slice %68 {offsets = [5, 0], sizes = [1, 128], strides = [1, 1]} : vector<6x128xf32> to vector<1x128xf32>
      %155 = vector.broadcast %153 : vector<1x128xf32> to vector<4x128xf32>
      %156 = arith.mulf %151, %155 : vector<4x128xf32>
      %157 = arith.addf %144, %156 : vector<4x128xf32>
      %158 = vector.broadcast %154 : vector<1x128xf32> to vector<4x128xf32>
      %159 = arith.mulf %152, %158 : vector<4x128xf32>
      %160 = arith.subf %157, %159 : vector<4x128xf32>
      %161 = vector.broadcast %154 : vector<1x128xf32> to vector<4x128xf32>
      %162 = arith.mulf %151, %161 : vector<4x128xf32>
      %163 = arith.addf %150, %162 : vector<4x128xf32>
      %164 = vector.broadcast %153 : vector<1x128xf32> to vector<4x128xf32>
      %165 = arith.mulf %152, %164 : vector<4x128xf32>
      %166 = arith.addf %163, %165 : vector<4x128xf32>
      %c0_32 = arith.constant 0 : index
      %c0_33 = arith.constant 0 : index
      %167 = vector.load %arg7[%c0_32, %c0_33] : memref<8x128xf32, #tpu.memory_space<vmem>>, vector<4x128xf32>
      tpu.vector_store %arg7[%c0_32, %c0_33], %160 {strides = array<i32>} : memref<8x128xf32, #tpu.memory_space<vmem>>, vector<4x128xf32>,
      %c4 = arith.constant 4 : index
      %c0_34 = arith.constant 0 : index
      %168 = vector.load %arg7[%c4, %c0_34] : memref<8x128xf32, #tpu.memory_space<vmem>>, vector<4x128xf32>
      tpu.vector_store %arg7[%c4, %c0_34], %166 {strides = array<i32>} : memref<8x128xf32, #tpu.memory_space<vmem>>, vector<4x128xf32>,
    } else {
    }
    return
  }
  func.func @transform_0(%arg0: i32, %arg1: i32) -> (i32, i32) {
    %c0_i32 = arith.constant 0 : i32
    %c0_i32_0 = arith.constant 0 : i32
    %c0_i32_1 = arith.constant 0 : i32
    return %c0_i32, %c0_i32_0 : i32, i32
  }
  func.func @transform_1(%arg0: i32, %arg1: i32) -> (i32, i32) {
    %c0_i32 = arith.constant 0 : i32
    %c0_i32_0 = arith.constant 0 : i32
    return %arg1, %c0_i32 : i32, i32
  }
  func.func @transform_2(%arg0: i32, %arg1: i32) -> (i32, i32) {
    %c0_i32 = arith.constant 0 : i32
    %c0_i32_0 = arith.constant 0 : i32
    %c0_i32_1 = arith.constant 0 : i32
    return %c0_i32, %c0_i32_0 : i32, i32
  }
  func.func @transform_3(%arg0: i32, %arg1: i32) -> (i32, i32) {
    %c0_i32 = arith.constant 0 : i32
    %c0_i32_0 = arith.constant 0 : i32
    return %c0_i32, %arg0 : i32, i32
  }
  func.func @transform_4(%arg0: i32, %arg1: i32) -> (i32, i32, i32) {
    %c0_i32 = arith.constant 0 : i32
    %c0_i32_0 = arith.constant 0 : i32
    %c0_i32_1 = arith.constant 0 : i32
    return %c0_i32, %c0_i32_0, %arg0 : i32, i32, i32
  }
  func.func @transform_5(%arg0: i32, %arg1: i32) -> (i32, i32) {
    %c0_i32 = arith.constant 0 : i32
    %c0_i32_0 = arith.constant 0 : i32
    return %c0_i32, %arg0 : i32, i32
  }
}

</mosaic_0001>

<bundles_post_ra>
// kernel: tpu_custom_call.1
= control target key start
LH: loop header
LB: loop body
LE: loop exit
PB: predicated region body
PF: predicated region fallthrough
CT: control target
= control target key end

     0   :  { %s2672_s0 = inlined_call_operand.hbm [shape: f32[48,256], index: 0, kind: input, shape index: {}]   ;;  %s2673_s1 = inlined_call_operand.vmem [shape: f32[16,1], index: 1, kind: input, shape index: {}]   ;;  %s2674_s2 = inlined_call_operand.vmem [shape: f32[16,1], index: 2, kind: input, shape index: {}]   ;;  %s2675_s3 = inlined_call_operand.vmem [shape: f32[2,256], index: 3, kind: input, shape index: {}]   ;;  %s2676_s4 = inlined_call_operand.vmem [shape: f32[2,6,256], index: 4, kind: input, shape index: {}]   ;;  %s2677_s5 = inlined_call_operand.hbm [shape: f32[8,256], index: 5, kind: output, shape index: {}]  }
   0x1   :  { %2679 = sst [smem:[#allocation15_spill]] %s2672_s0 }
   0x2   :  { %2680 = sst [smem:[#allocation16_spill]] %s2676_s4 }
   0x3   :  { %10 = vsyncpa [#allocation7], 0 }
   0x4   :  { %11 = vsyncpa [#allocation8], 0 }
   0x5   :  { %13 = vsyncpa [#allocation8 + $0x1], 0  ;;  %s2180_s18 = smov 0   ;;  %s2182_s19 = smov 0  }
   0x6   :  { %s2184_s20 = smov 0   ;;  %s2186_s21 = smov 0  }
   0x7   :  { %s2188_s22 = smov 0   ;;  %s2190_s23 = smov 0  }
   0x8   :  { %s2192_s24 = smov 0   ;;  %s2194_s25 = smov 0  }
   0x9 LB: > { %s1827_s26 = sadd.s32 4294967295, %s2130_s25   ;;  %s1828_s27 = sadd.s32 4294967294, %s2130_s25   ;;  %s2130_s25 = sphi %s2194_s25, %s19_s25   ;;  %s2126_s24 = sphi %s2192_s24, %s2698_s24   ;;  %s2122_s23 = sphi %s2190_s23, %s2697_s23   ;;  %s2118_s22 = sphi %s2188_s22, %s2696_s22   ;;  %s2114_s21 = sphi %s2186_s21, %s2695_s21   ;;  %s2110_s20 = sphi %s2184_s20, %s2694_s20   ;;  %s2106_s19 = sphi %s2182_s19, %s2693_s19   ;;  %s2102_s18 = sphi %s2180_s18, %s2692_s18  }
   0xa   : > { %s28_s28 = sadd.s32 1, %s2122_s23  ;;  %s31_s29 = sadd.s32 1, %s2126_s24 }
   0xb   : > { %p29_p0 = scmp.ge.s32.totalorder %s28_s28, 2  ;;  %s132_s30 = sadd.s32 1, %s2110_s20 }
   0xc   : > { %p139_p1 = scmp.ne.s32.totalorder %s2110_s20, %s2106_s19  ;;  %p140_p2 = scmp.eq.s32.totalorder %s2130_s25, 0 }
   0xd   : > { %s2700_s28 = smov (%p29_p0, %s28_s28), 0  ;;  %s2702_s29 = smov (!%p29_p0, %s31_s29), %s2126_s24 }
   0xe   : > { %2681 = sst [smem:[#allocation13_spill]] %s2700_s28  ;;  %p2231_p3 = por %p140_p2, %p139_p1 }
   0xf   : > { %p169_p4 = scmp.eq.s32.totalorder %s1827_s26, 3  ;;  %p33_p5 = scmp.ge.s32.totalorder %s2702_s29, 2 }
  0x10   : > { %p174_p6 = scmp.ne.s32.totalorder %s2106_s19, %s2102_s18  ;;  %p175_p8 = scmp.eq.s32.totalorder %s1828_s27, 3 }
  0x11   : > { %p2237_p7 = por %p169_p4, %p139_p1  ;;  %s2704_s29 = smov (%p33_p5, %s2702_s29), 0 }
  0x12   : > { %2684 = sst [smem:[#allocation14_spill]] %s2704_s29  ;;  %p2243_p9 = por %p175_p8, %p174_p6 }
  0x13   : > { %p1829_p10 = scmp.ge.s32.totalorder %s2130_s25, 1  ;;  %s129_s9 = ssub.s32 %s2126_s24, %s2704_s29 }
  0x14   : > { %p182_p11 = scmp.lt.s32.totalorder %s2130_s25, 5  ;;  %p130_p12 = scmp.eq.s32.totalorder %s129_s9, 0 }
  0x15   : > { %p2255_p0 = scmp.eq.s32.totalorder %s1827_s26, 0  ;;  %s2688_s0 = sld [smem:[#allocation15_spill]] }
  0x16   : > { %p2251_p13 = pnand %p1829_p10, %p182_p11  ;;  %s2132_s16 = smov [#allocation6]  }
  0x17   : > { %s2260_s12 = scalar_select %p130_p12, %s2110_s20, %s132_s30  }
  0x18   : > { %p1905_p1 = pneg %p2251_p13  ;;  %s195_s17 = sshll.u32 %s2132_s16, 4  ;;  %s196_s17 = int_to_ptr.vmem [resolvable:$true] %s195_s17 }
  0x19   : > { %s2133_s27 = smov 256   ;;  %s2134_s26 = smov 16  }
  0x1a   : > { %p1906_p2 = pnand %p2255_p0, %p1905_p1  ;;  %p1831_p4 = scmp.ge.s32.totalorder %s2130_s25, 4 }
  0x1b   : > { %s193_s15 = sshll.u32 %s2688_s0, 4  ;;  %s194_s15 = int_to_ptr.hbm [resolvable:$true] %s193_s15 }
  0x1c   : > { %1908 = dma.hbm_to_vmem [thread:$0]  (!%p1906_p2), %s194_s15, 1536, %s196_s17, [#allocation7], %s2133_s27, %s2133_s27, %s2134_s26  }
  0x1d   : > { %208 = sbr.rel (%p1831_p4) target bundleno = 46 (0x2e), region = 24 }
  0x22   : > { %225 = sbr.rel (!%p2231_p3) target bundleno = 46 (0x2e), region = 36  ;;  %s227_s30 = sand.u32 (%p2231_p3), 1, %s2110_s20  }
  0x23   : > { %s1833_s9 = sshll.u32 (%p2231_p3), %s2126_s24, 3  ;;  %s1832_s13 = sshll.u32 (%p2231_p3), %s227_s30, 4 }
  0x24   : > { %s2689_s4 = sld [smem:[#allocation16_spill]] (%p2231_p3)  ;;  %s229_s29 = scalar_lea.vmem (%p2231_p3), [#allocation9], %s1832_s13 }
  0x2a   : > { %s231_s16 = scalar_lea.vmem %s2689_s4, %s1833_s9 }
  0x2b   : > { %v262_v0 = vld [vmem:[%s231_s16] sm:$0xff]  ;;  %v264_v1 = vld [vmem:[%s231_s16 + $0x10] sm:$0xff] }
  0x2c   : > { %263 = vst [vmem:[%s229_s29] sm:$0xff] %v262_v0 }
  0x2d   : > { %265 = vst [vmem:[%s229_s29 + $0x8] sm:$0xff] %v264_v1 }
  0x2e PF: > { %274 = sbr.rel (%p2251_p13) target bundleno = 771 (0x303), region = 74 }
  0x33   : > { %2093 = dma.done.wait (%p2255_p0), [#allocation7], 1536  }
  0x34   : > { %2095 = vsyncadd (%p2255_p0), [#allocation7], 4294965760  ;;  %s2284_s0 = sand.u32 1, %s2106_s19   ;;  %p317_p3 = scmp.lt.s32.totalorder %s2114_s21, 1 }
  0x35   : > { %s1836_s29 = sshll.u32 %s2284_s0, 4  ;;  %s1837_s6 = sshll.u32 %s2284_s0, 3 }
  0x36   : > { %s318_s10 = scalar_select %p317_p3, %s2114_s21, 1 }
  0x37   : > { %p321_p5 = scmp.lt.s32.totalorder %s2118_s22, 1  ;;  %s2302_s16 = scalar_lea.vmem [#allocation9], %s1836_s29 }
  0x38   : > { %s1838_s15 = sshll.u32 %s318_s10, 3  ;;  %s2304_s4 = scalar_lea.vmem [#allocation10], %s1837_s6 }
  0x39   : > { %s2294_s11 = scalar_lea.vmem %s2673_s1, %s1838_s15  ;;  %p1840_p6 = scmp.ne.s32.totalorder %s2114_s21, 0 }
  0x3a   : > { %s322_s26 = scalar_select %p321_p5, %s2118_s22, 1 }
  0x3b   : > { %328 = sbr.rel (%p1840_p6) target bundleno = 308 (0x134), region = 86 }
  0x3c   : > { %s1839_s30 = sshll.u32 %s322_s26, 1 }
  0x3d   : > { %s2300_s14 = scalar_lea.vmem %s2675_s3, %s1839_s30 }
  0x40   : > { %v341_v2 = vld [vmem:[%s2674_s2] sm:$0xff]  ;;  %v2135_v3 = vmov 0   ;;  %v342_v4 = vld [vmem:[%s2674_s2 + $0x8] sm:$0xff]  ;;  %v2136_v5 = vmov 0.0   ;;  %v2137_v36 = vmov 683565275  }
  0x41   : > { %1998 = vset.pattern.permute.xlu0 %v2135_v3  ;;  %329 = vst [vmem:[#allocation4 + $0x8] sm:$0xff] %v2136_v5  ;;  %v1999_v6 = vld [vmem:[%s2300_s14 + $0x1] ss:$0 sm:$0xff]  ;;  %v2138_v38 = vmov 2475754826  }
  0x42   : > { %346 = vperm.xlu0 %1998, %v341_v2   ;;  %330 = vst [vmem:[#allocation4] sm:$0xff] %v2136_v5  ;;  %v2139_v42 = vmov 2131351028   ;;  %v2140_v45 = vmov 2102212464  }
  0x43   : > { %331 = vst [vmem:[#allocation4 + $0x20] sm:$0xff] %v2136_v5  ;;  %v2141_v48 = vmov 920167782   ;;  %v2142_v51 = vmov 1326507024  }
  0x44   : > { %332 = vst [vmem:[#allocation4 + $0x10] sm:$0xff] %v2136_v5 }
  0x45   : > { %333 = vst [vmem:[#allocation4 + $0x18] sm:$0xff] %v2136_v5 }
  0x46   : > { %334 = vst [vmem:[#allocation4 + $0x28] sm:$0xff] %v2136_v5 }
  0x47   : > { %335 = vst [vmem:[#allocation5] sm:$0xff] %v2136_v5 }
  0x48   : > { %336 = vst [vmem:[#allocation5 + $0x18] sm:$0xff] %v2136_v5 }
  0x49   : > { %337 = vst [vmem:[#allocation5 + $0x10] sm:$0xff] %v2136_v5 }
  0x4a   : > { %351 = vperm.xlu0 %1998, %v342_v4   ;;  %338 = vst [vmem:[#allocation5 + $0x20] sm:$0xff] %v2136_v5 }
  0x4b   : > { %339 = vst [vmem:[#allocation5 + $0x28] sm:$0xff] %v2136_v5 }
  0x4c   : > { %340 = vst [vmem:[#allocation5 + $0x8] sm:$0xff] %v2136_v5 }
  0xb4   : > { %v347_v7 = vpop.permute.xlu0 %346 }
  0xb5   : > { %v355_v8 = vmul.f32 %v1999_v6, %v347_v7 }
  0xb7   : > { %v357_v9 = vadd.f32 0.5, %v355_v8 }
  0xb9   : > { %v359_v10 = vfloor.f32 %v357_v9 }
  0xbb   : > { %v361_v11 = vsub.f32 %v355_v8, %v359_v10 }
  0xbc   : > { %v352_v12 = vpop.permute.xlu0 %351 }
  0xbd   : > { %v356_v13 = vmul.f32 %v1999_v6, %v352_v12  ;;  %v2315_v14 = vmul.f32 -6.2831855, %v361_v11 }
  0xbf   : > { %v358_v15 = vadd.f32 0.5, %v356_v13  ;;  %v365_v16 = vand.u32 2147483647, %v2315_v14  ;;  %v368_v17 = vand.u32 2139095040, %v2315_v14 }
  0xc1   : > { %v360_v18 = vfloor.f32 %v358_v15  ;;  %v369_v19 = vshrl.u32 %v368_v17, 23  ;;  %v372_v20 = vand.u32 8388607, %v365_v16 }
  0xc3   : > { %v362_v21 = vsub.f32 %v356_v13, %v360_v18  ;;  %v1841_v22 = vadd.s32 4294967169, %v369_v19  ;;  %v373_v23 = vor.u32 8388608, %v372_v20 }
  0xc5   : > { %v2321_v24 = vmul.f32 -6.2831855, %v362_v21  ;;  %v375_v25 = vadd.s32 1, %v1841_v22  ;;  %v2323_v26 = vshll.u32 %v373_v23, 8 }
  0xc7   : > { %vm376_vm0 = vcmp.gt.s32.totalorder %v375_v25, 0  ;;  %v519_v28 = vand.u32 2147483647, %v2321_v24  ;;  %v522_v29 = vand.u32 2139095040, %v2321_v24  ;;  %v414_v32 = vand.u32 65535, %v2323_v26 }
  0xc8   : > { %v377_v27 = vsel %vm376_vm0, %v375_v25, 0  ;;  %v415_v33 = vshrl.u32 %v2323_v26, 16 }
  0xc9   : > { %v379_v30 = vand.u32 31, %v377_v27  ;;  %v523_v34 = vshrl.u32 %v522_v29, 23  ;;  %v378_v35 = vshrl.u32 %v377_v27, 5  ;;  %v2333_v40 = vand.u32 8388607, %v519_v28 }
  0xcb   : > { %v380_v31 = vsub.s32 32, %v379_v30  ;;  %v382_v37 = vshll.u32 %v2137_v36, %v379_v30  ;;  %v385_v39 = vshll.u32 %v2138_v38, %v379_v30  ;;  %v388_v44 = vshll.u32 %v2139_v42, %v379_v30 }
  0xcc   : > { %v391_v47 = vshll.u32 %v2140_v45, %v379_v30  ;;  %v394_v50 = vshll.u32 %v2141_v48, %v379_v30  ;;  %v1844_v56 = vadd.s32 4294967169, %v523_v34  ;;  %vm397_vm1 = vcmp.lt.s32.totalorder %v378_v35, 1 }
  0xcd   : > { %v383_v41 = vshrl.u32 %v2138_v38, %v380_v31  ;;  %v386_v43 = vshrl.u32 %v2139_v42, %v380_v31  ;;  %v389_v46 = vshrl.u32 %v2140_v45, %v380_v31  ;;  %v392_v49 = vshrl.u32 %v2141_v48, %v380_v31 }
  0xce   : > { %v395_v52 = vshrl.u32 %v2142_v51, %v380_v31  ;;  %vm400_vm2 = vcmp.lt.s32.totalorder %v378_v35, 4  ;;  %v381_v59 = vshrl.u32 %v2137_v36, %v380_v31  ;;  %vm399_vm3 = vcmp.lt.s32.totalorder %v378_v35, 3 }
  0xcf   : > { %v384_v53 = vor.u32 %v383_v41, %v382_v37  ;;  %v387_v54 = vor.u32 %v386_v43, %v385_v39  ;;  %v390_v55 = vor.u32 %v389_v46, %v388_v44  ;;  %v393_v57 = vor.u32 %v392_v49, %v391_v47 }
  0xd0   : > { %v396_v58 = vor.u32 %v395_v52, %v394_v50  ;;  %v529_v1 = vadd.s32 1, %v1844_v56  ;;  %vm398_vm4 = vcmp.lt.s32.totalorder %v378_v35, 2  ;;  %v527_v13 = vor.u32 8388608, %v2333_v40 }
  0xd1   : > { %v402_v60 = vsel %vm400_vm2, %v390_v55, 2102212464  ;;  %v405_v61 = vsel %vm397_vm1, %v384_v53, %v387_v54  ;;  %v409_v62 = vsel %vm397_vm1, %v387_v54, %v390_v55  ;;  %v406_v63 = vsel %vm400_vm2, %v393_v57, 920167782 }
  0xd2   : > { %v410_v0 = vsel %vm400_vm2, %v396_v58, 1326507024  ;;  %v401_v2 = vsel %vm397_vm1, %v381_v59, %v384_v53  ;;  %v407_v4 = vsel %vm399_vm3, %v390_v55, %v406_v63  ;;  %v403_v6 = vsel %vm399_vm3, %v387_v54, %v402_v60 }
  0xd3   : > { %v411_v5 = vsel %vm399_vm3, %v393_v57, %v410_v0  ;;  %v408_v7 = vsel %vm398_vm4, %v405_v61, %v407_v4  ;;  %vm530_vm5 = vcmp.gt.s32.totalorder %v529_v1, 0  ;;  %v2345_v15 = vsel %vm398_vm4, %v401_v2, %v403_v6 }
  0xd4   : > { %v412_v8 = vsel %vm398_vm4, %v409_v62, %v411_v5  ;;  %v438_v11 = vand.u32 65535, %v408_v7  ;;  %v439_v12 = vshrl.u32 %v408_v7, 16  ;;  %v531_v19 = vsel %vm530_vm5, %v529_v1, 0 }
  0xd5   : > { %v416_v9 = vand.u32 65535, %v412_v8  ;;  %v417_v10 = vshrl.u32 %v412_v8, 16  ;;  %v533_v41 = vand.u32 31, %v531_v19  ;;  %v2352_v52 = vshrl.u32 %v531_v19, 5 }
  0xd6   : > { %v441_v22 = vmul.u32 %v439_v12, %v414_v32  ;;  %v442_v23 = vmul.u32 %v438_v11, %v415_v33  ;;  %v440_v29 = vmul.u32 %v438_v11, %v414_v32  ;;  %v443_v30 = vmul.u32 %v439_v12, %v415_v33 }
  0xd7   : > { %v419_v17 = vmul.u32 %v417_v10, %v414_v32  ;;  %v420_v18 = vmul.u32 %v416_v9, %v415_v33  ;;  %v418_v20 = vmul.u32 %v416_v9, %v414_v32  ;;  %v421_v21 = vmul.u32 %v417_v10, %v415_v33 }
  0xd8   : > { %v444_v35 = vshll.u32 %v441_v22, 16  ;;  %v445_v37 = vshrl.u32 %v441_v22, 16  ;;  %v446_v40 = vshll.u32 %v442_v23, 16  ;;  %v447_v44 = vshrl.u32 %v442_v23, 16 }
  0xd9   : > { %v422_v25 = vshll.u32 %v419_v17, 16  ;;  %v423_v27 = vshrl.u32 %v419_v17, 16  ;;  %v424_v31 = vshll.u32 %v420_v18, 16  ;;  %v425_v34 = vshrl.u32 %v420_v18, 16 }
  0xda   : > { %vm448_vm7 = vc.u32 %v440_v29, %v444_v35  ;;  %v450_v46 = vadd.s32 %v444_v35, %v440_v29  ;;  %v2349_v50 = vsub.s32 32, %v533_v41  ;;  %v536_v56 = vshll.u32 %v2137_v36, %v533_v41 }
  0xdb   : > { %vm426_vm6 = vc.u32 %v418_v20, %v422_v25  ;;  %v428_v39 = vadd.s32 %v422_v25, %v418_v20  ;;  %v449_v49 = vsel %vm448_vm7, 1, %v2135_v3  ;;  %v539_v59 = vshll.u32 %v2138_v38, %v533_v41 }
  0xdc   : > { %v427_v43 = vsel %vm426_vm6, 1, %v2135_v3  ;;  %v451_v33 = vadd.s32 %v449_v49, %v443_v30  ;;  %vm452_vm9 = vc.u32 %v450_v46, %v446_v40  ;;  %v2355_v55 = vadd.s32 %v450_v46, %v446_v40 }
  0xdd   : > { %v429_v47 = vadd.s32 %v427_v43, %v421_v21  ;;  %vm430_vm8 = vc.u32 %v428_v39, %v424_v31  ;;  %v453_v54 = vsel %vm452_vm9, 1, %v2135_v3  ;;  %v537_v58 = vshrl.u32 %v2138_v38, %v2349_v50 }
  0xde   : > { %v431_v32 = vsel %vm430_vm8, 1, %v2135_v3  ;;  %v455_v57 = vadd.s32 %v453_v54, %v451_v33  ;;  %v540_v60 = vshrl.u32 %v2139_v42, %v2349_v50  ;;  %v542_v62 = vshll.u32 %v2139_v42, %v533_v41 }
  0xdf   : > { %v433_v53 = vadd.s32 %v431_v32, %v429_v47  ;;  %v543_v63 = vshrl.u32 %v2140_v45, %v2349_v50  ;;  %v545_v0 = vshll.u32 %v2140_v45, %v533_v41  ;;  %v2367_v2 = vor.u32 %v537_v58, %v536_v56 }
  0xe0   : > { %v456_v1 = vadd.s32 %v455_v57, %v445_v37  ;;  %v2369_v4 = vor.u32 %v540_v60, %v539_v59  ;;  %v546_v5 = vshrl.u32 %v2141_v48, %v2349_v50  ;;  %v548_v7 = vshll.u32 %v2141_v48, %v533_v41 }
  0xe1   : > { %v434_v61 = vadd.s32 %v433_v53, %v423_v27  ;;  %v544_v6 = vor.u32 %v543_v63, %v542_v62  ;;  %v549_v42 = vshrl.u32 %v2142_v51, %v2349_v50  ;;  %vm551_vm11 = vcmp.lt.s32.totalorder %v2352_v52, 1 }
  0xe2   : > { %v457_v8 = vadd.s32 %v456_v1, %v447_v44  ;;  %v547_v9 = vor.u32 %v546_v5, %v545_v0  ;;  %v2381_v10 = vshll.u32 %v527_v13, 8  ;;  %v458_v11 = vmul.u32 %v2323_v26, %v2345_v15 }
  0xe3   : > { %v2373_v38 = vadd.s32 %v434_v61, %v425_v34  ;;  %v550_v45 = vor.u32 %v549_v42, %v548_v7  ;;  %vm554_vm12 = vcmp.lt.s32.totalorder %v2352_v52, 4  ;;  %v559_v48 = vsel %vm551_vm11, %v2367_v2, %v2369_v4 }
  0xe4   : > { %v461_v12 = vadd.s32 1, %v457_v8  ;;  %vm553_vm13 = vcmp.lt.s32.totalorder %v2352_v52, 3  ;;  %v560_v51 = vsel %vm554_vm12, %v547_v9, 920167782  ;;  %v563_v13 = vsel %vm551_vm11, %v2369_v4, %v544_v6 }
  0xe5   : > { %vm460_vm10 = vc.u32 %v2373_v38, %v2355_v55  ;;  %v564_v26 = vsel %vm554_vm12, %v550_v45, 1326507024  ;;  %vm552_vm14 = vcmp.lt.s32.totalorder %v2352_v52, 2  ;;  %v561_v17 = vsel %vm553_vm13, %v544_v6, %v560_v51 }
  0xe6   : > { %v462_v15 = vsel %vm460_vm10, %v461_v12, %v457_v8  ;;  %v565_v18 = vsel %vm553_vm13, %v547_v9, %v564_v26  ;;  %v562_v20 = vsel %vm552_vm14, %v559_v48, %v561_v17  ;;  %v568_v22 = vand.u32 65535, %v2381_v10 }
  0xe7   : > { %v463_v19 = vadd.s32 %v462_v15, %v458_v11  ;;  %v566_v21 = vsel %vm552_vm14, %v563_v13, %v565_v18  ;;  %v569_v23 = vshrl.u32 %v2381_v10, 16  ;;  %v593_v29 = vshrl.u32 %v562_v20, 16 }
  0xe8   : > { %v570_v25 = vand.u32 65535, %v566_v21  ;;  %v571_v27 = vshrl.u32 %v566_v21, 16  ;;  %v592_v31 = vand.u32 65535, %v562_v20  ;;  %v556_v5 = vsel %vm554_vm12, %v544_v6, 2102212464 }
  0xe9   : > { %v464_v30 = vadd.s32 536870912, %v463_v19  ;;  %v595_v39 = vmul.u32 %v593_v29, %v568_v22  ;;  %v597_v60 = vmul.u32 %v593_v29, %v569_v23  ;;  %v535_v9 = vshrl.u32 %v2137_v36, %v2349_v50 }
  0xea   : > { %v573_v34 = vmul.u32 %v571_v27, %v568_v22  ;;  %v574_v35 = vmul.u32 %v570_v25, %v569_v23  ;;  %v572_v40 = vmul.u32 %v570_v25, %v568_v22  ;;  %v575_v44 = vmul.u32 %v571_v27, %v569_v23 }
  0xeb   : > { %v2409_v37 = vshrl.u32 %v464_v30, 30  ;;  %v594_v46 = vmul.u32 %v592_v31, %v568_v22  ;;  %v598_v47 = vshll.u32 %v595_v39, 16  ;;  %v596_v33 = vmul.u32 %v592_v31, %v569_v23 }
  0xec   : > { %v576_v41 = vshll.u32 %v573_v34, 16  ;;  %v578_v49 = vshll.u32 %v574_v35, 16  ;;  %v577_v56 = vshrl.u32 %v573_v34, 16  ;;  %v579_v45 = vshrl.u32 %v574_v35, 16 }
  0xed   : > { %v466_v43 = vshll.u32 %v2409_v37, 30  ;;  %vm602_vm1 = vc.u32 %v594_v46, %v598_v47  ;;  %v600_v62 = vshll.u32 %v596_v33, 16  ;;  %v604_v0 = vadd.s32 %v598_v47, %v594_v46 }
  0xee   : > { %vm580_vm15 = vc.u32 %v572_v40, %v576_v41  ;;  %v582_v32 = vadd.s32 %v576_v41, %v572_v40  ;;  %v603_v63 = vsel %vm602_vm1, 1, %v2135_v3  ;;  %v599_v48 = vshrl.u32 %v595_v39, 16 }
  0xef   : > { %v467_v53 = vsub.s32 %v463_v19, %v466_v43  ;;  %v581_v54 = vsel %vm580_vm15, 1, %v2135_v3  ;;  %v605_v8 = vadd.s32 %v603_v63, %v597_v60  ;;  %vm606_vm3 = vc.u32 %v604_v0, %v600_v62 }
  0xf0   : > { %v583_v57 = vadd.s32 %v581_v54, %v575_v44  ;;  %vm584_vm0 = vc.u32 %v582_v32, %v578_v49  ;;  %v607_v11 = vsel %vm606_vm3, 1, %v2135_v3  ;;  %v555_v13 = vsel %vm551_vm11, %v535_v9, %v2367_v2 }
  0xf1   : > { %vm468_vm2 = vcmp.lt.s32.totalorder %v467_v53, 0  ;;  %v469_v58 = vsub.s32 0, %v467_v53  ;;  %v585_v59 = vsel %vm584_vm0, 1, %v2135_v3  ;;  %v609_v51 = vadd.s32 %v607_v11, %v605_v8 }
  0xf2   : > { %v587_v61 = vadd.s32 %v585_v59, %v583_v57  ;;  %v557_v6 = vsel %vm553_vm13, %v2369_v4, %v556_v5  ;;  %v601_v15 = vshrl.u32 %v596_v33, 16  ;;  %v459_v36 = vadd.s32 %v2355_v55, %v2373_v38 }
  0xf3   : > { %v470_v1 = vsel %vm468_vm2, %v469_v58, %v467_v53  ;;  %v610_v17 = vadd.s32 %v609_v51, %v599_v48  ;;  %v608_v3 = vadd.s32 %v604_v0, %v600_v62  ;;  %v558_v20 = vsel %vm552_vm14, %v555_v13, %v557_v6 }
  0xf4   : > { %v471_v7 = vclz %v470_v1  ;;  %v588_v42 = vadd.s32 %v587_v61, %v577_v56  ;;  %v612_v25 = vmul.u32 %v2381_v10, %v558_v20  ;;  %vm367_vm6 = vcmp.lt.s32.totalorder %v2315_v14, 0 }
  0xf5   : > { %v611_v21 = vadd.s32 %v610_v17, %v601_v15  ;;  %v489_v43 = vsub.s32 4, %v2409_v37  ;;  %vm366_vm7 = vcmp.le.f32.partialorder %v365_v16, 0.7853982  ;;  %vm508_vm0 = vweird.f32 %v2315_v14 }
  0xf6   : > { %v1842_v12 = vadd.s32 4294967294, %v471_v7  ;;  %v589_v26 = vadd.s32 %v588_v42, %v579_v45  ;;  %vm521_vm1 = vcmp.lt.s32.totalorder %v2321_v24, 0  ;;  %vm520_vm2 = vcmp.le.f32.partialorder %v519_v28, 0.7853982 }
  0xf7   : > { %v615_v4 = vadd.s32 1, %v611_v21  ;;  %v490_v32 = vsel %vm367_vm6, %v489_v43, %v2409_v37 }
  0xf8   : > { %vm1843_vm4 = vcmp.lt.s32.totalorder %v1842_v12, 0  ;;  %vm614_vm5 = vc.u32 %v589_v26, %v608_v3  ;;  %v492_v57 = vsel %vm366_vm7, 0, %v490_v32  ;;  %v613_v5 = vadd.s32 %v608_v3, %v589_v26 }
  0xf9   : > { %v474_v50 = vsel %vm1843_vm4, 0, %v1842_v12  ;;  %v616_v30 = vsel %vm614_vm5, %v615_v4, %v611_v21  ;;  %v819_v63 = vadd.s32 3, %v492_v57  ;;  %v509_v45 = vand.u32 3, %v492_v57 }
  0xfa   : > { %v475_v18 = vsub.s32 32, %v474_v50  ;;  %v479_v19 = vsub.s32 4294967266, %v474_v50  ;;  %v476_v2 = vshll.u32 %v467_v53, %v474_v50  ;;  %v617_v31 = vadd.s32 %v616_v30, %v612_v25 }
  0xfb   : > { %v820_v13 = vand.u32 3, %v819_v63  ;;  %vm510_vm10 = vcmp.lt.s32.totalorder %v509_v45, 2  ;;  %vm511_vm11 = vcmp.eq.s32.totalorder %v509_v45, 0  ;;  %vm514_vm12 = vcmp.eq.s32.totalorder %v509_v45, 2 }
  0xfc   : > { %v477_v22 = vshrl.u32 %v459_v36, %v475_v18  ;;  %v480_v23 = vadd.s32 127, %v479_v19  ;;  %v618_v38 = vadd.s32 536870912, %v617_v31 }
  0xfd   : > { %vm821_vm13 = vcmp.lt.s32.totalorder %v820_v13, 2  ;;  %vm822_vm14 = vcmp.eq.s32.totalorder %v820_v13, 0  ;;  %vm825_vm15 = vcmp.eq.s32.totalorder %v820_v13, 2 }
  0xfe   : > { %v478_v27 = vor.u32 %v477_v22, %v476_v2  ;;  %v481_v29 = vshll.u32 %v480_v23, 23  ;;  %v2431_v39 = vshrl.u32 %v618_v38, 30 }
 0x100   : > { %v482_v55 = vor.u32 4788187, %v481_v29  ;;  %v485_v35 = vcvt.s32.f32 %v478_v27  ;;  %v620_v40 = vshll.u32 %v2431_v39, 30 }
 0x102   : > { %v483_v34 = vand.u32 2147483647, %v482_v55  ;;  %v621_v44 = vsub.s32 %v617_v31, %v620_v40  ;;  %v643_v31 = vsub.s32 4, %v2431_v39 }
 0x104   : > { %v486_v52 = vmul.f32 %v485_v35, %v483_v34  ;;  %vm622_vm8 = vcmp.lt.s32.totalorder %v621_v44, 0  ;;  %v623_v47 = vsub.s32 0, %v621_v44  ;;  %v644_v35 = vsel %vm521_vm1, %v643_v31, %v2431_v39 }
 0x106   : > { %v487_v41 = vxor.u32 2147483648, %v486_v52  ;;  %v624_v33 = vsel %vm622_vm8, %v623_v47, %v621_v44 }
 0x107   : > { %v625_v56 = vclz %v624_v33 }
 0x108   : > { %v488_v10 = vsel %vm367_vm6, %v487_v41, %v486_v52  ;;  %v646_v41 = vsel %vm520_vm2, 0, %v644_v35 }
 0x109   : > { %v491_v46 = vsel %vm366_vm7, %v2315_v14, %v488_v10  ;;  %v1845_v60 = vadd.s32 4294967294, %v625_v56  ;;  %v974_v47 = vadd.s32 3, %v646_v41 }
 0x10a   : > { %v493_v49 = vmul.f32 %v491_v46, %v491_v46 }
 0x10b   : > { %vm1846_vm9 = vcmp.lt.s32.totalorder %v1845_v60, 0 }
 0x10c   : > { %v494_v53 = vmul.f32 -0.001358992, %v493_v49  ;;  %v501_v54 = vmul.f32 -0.00019511016, %v493_v49  ;;  %v628_v16 = vsel %vm1846_vm9, 0, %v1845_v60  ;;  %vm662_vm9 = vweird.f32 %v2321_v24 }
 0x10d   : > { %v629_v7 = vsub.s32 32, %v628_v16  ;;  %v633_v42 = vsub.s32 4294967266, %v628_v16  ;;  %v630_v11 = vshll.u32 %v621_v44, %v628_v16 }
 0x10e   : > { %v495_v58 = vadd.f32 0.041655596, %v494_v53  ;;  %v502_v59 = vadd.f32 0.008332121, %v501_v54  ;;  %v663_v53 = vand.u32 3, %v646_v41  ;;  %v975_v54 = vand.u32 3, %v974_v47 }
 0x10f   : > { %v631_v9 = vshrl.u32 %v613_v5, %v629_v7  ;;  %v634_v12 = vadd.s32 127, %v633_v42 }
 0x110   : > { %v496_v61 = vmul.f32 %v495_v58, %v493_v49  ;;  %v503_v62 = vmul.f32 %v502_v59, %v493_v49  ;;  %vm664_vm3 = vcmp.lt.s32.totalorder %v663_v53, 2  ;;  %vm665_vm4 = vcmp.eq.s32.totalorder %v663_v53, 0 }
 0x111   : > { %v632_v6 = vor.u32 %v631_v9, %v630_v11  ;;  %v635_v15 = vshll.u32 %v634_v12, 23  ;;  %vm668_vm5 = vcmp.eq.s32.totalorder %v663_v53, 2  ;;  %vm976_vm6 = vcmp.lt.s32.totalorder %v975_v54, 2 }
 0x112   : > { %v497_v0 = vadd.f32 -0.4999988, %v496_v61  ;;  %v504_v1 = vadd.f32 -0.16666654, %v503_v62  ;;  %vm977_vm7 = vcmp.eq.s32.totalorder %v975_v54, 0  ;;  %vm980_vm8 = vcmp.eq.s32.totalorder %v975_v54, 2 }
 0x113   : > { %v636_v50 = vor.u32 4788187, %v635_v15  ;;  %v639_v3 = vcvt.s32.f32 %v632_v6 }
 0x114   : > { %v498_v8 = vmul.f32 %v497_v0, %v493_v49  ;;  %v505_v37 = vmul.f32 %v504_v1, %v493_v49 }
 0x115   : > { %v637_v26 = vand.u32 2147483647, %v636_v50 }
 0x116   : > { %v499_v48 = vadd.f32 1.0, %v498_v8  ;;  %v506_v51 = vadd.f32 1.0, %v505_v37 }
 0x117   : > { %v640_v23 = vmul.f32 %v639_v3, %v637_v26 }
 0x118   : > { %v507_v17 = vmul.f32 %v506_v51, %v491_v46  ;;  %v515_v36 = vxor.u32 2147483648, %v499_v48 }
 0x119   : > { %v641_v29 = vxor.u32 2147483648, %v640_v23 }
 0x11a   : > { %v512_v18 = vxor.u32 2147483648, %v507_v17  ;;  %v516_v20 = vsel %vm514_vm12, %v515_v36, %v507_v17  ;;  %v827_v2 = vsel %vm825_vm15, %v515_v36, %v507_v17 }
 0x11b   : > { %v642_v30 = vsel %vm521_vm1, %v641_v29, %v640_v23 }
 0x11c   : > { %v513_v19 = vsel %vm511_vm11, %v499_v48, %v512_v18  ;;  %v824_v21 = vsel %vm822_vm14, %v499_v48, %v512_v18  ;;  %v645_v55 = vsel %vm520_vm2, %v2321_v24, %v642_v30 }
 0x11d   : > { %v517_v22 = vsel %vm510_vm10, %v513_v19, %v516_v20  ;;  %v828_v4 = vsel %vm821_vm13, %v824_v21, %v827_v2  ;;  %v647_v38 = vmul.f32 %v645_v55, %v645_v55 }
 0x11e   : > { %v518_v25 = vsel %vm508_vm0, nan, %v517_v22  ;;  %v829_v27 = vsel %vm508_vm0, nan, %v828_v4 }
 0x11f   : > { %673 = vst [vmem:[#allocation2] sm:$0xff] %v518_v25  ;;  %v648_v14 = vmul.f32 -0.001358992, %v647_v38  ;;  %v655_v34 = vmul.f32 -0.00019511016, %v647_v38 }
 0x120   : > { %985 = vst [vmem:[#allocation3 + $0x8] sm:$0xff] %v829_v27 }
 0x121   : > { %v649_v52 = vadd.f32 0.041655596, %v648_v14  ;;  %v656_v40 = vadd.f32 0.008332121, %v655_v34 }
 0x123   : > { %v650_v43 = vmul.f32 %v649_v52, %v647_v38  ;;  %v657_v44 = vmul.f32 %v656_v40, %v647_v38 }
 0x125   : > { %v651_v10 = vadd.f32 -0.4999988, %v650_v43  ;;  %v658_v46 = vadd.f32 -0.16666654, %v657_v44 }
 0x127   : > { %v652_v49 = vmul.f32 %v651_v10, %v647_v38  ;;  %v659_v28 = vmul.f32 %v658_v46, %v647_v38 }
 0x129   : > { %v653_v32 = vadd.f32 1.0, %v652_v49  ;;  %v660_v33 = vadd.f32 1.0, %v659_v28 }
 0x12b   : > { %v661_v56 = vmul.f32 %v660_v33, %v645_v55  ;;  %v669_v57 = vxor.u32 2147483648, %v653_v32 }
 0x12d   : > { %v666_v58 = vxor.u32 2147483648, %v661_v56  ;;  %v670_v59 = vsel %vm668_vm5, %v669_v57, %v661_v56  ;;  %v982_v61 = vsel %vm980_vm8, %v669_v57, %v661_v56 }
 0x12f   : > { %v667_v39 = vsel %vm665_vm4, %v653_v32, %v666_v58  ;;  %v979_v60 = vsel %vm977_vm7, %v653_v32, %v666_v58 }
 0x130   : > { %v671_v62 = vsel %vm664_vm3, %v667_v39, %v670_v59  ;;  %v983_v16 = vsel %vm976_vm6, %v979_v60, %v982_v61 }
 0x131   : > { %v672_v63 = vsel %vm662_vm9, nan, %v671_v62  ;;  %v984_v0 = vsel %vm662_vm9, nan, %v983_v16 }
 0x132   : > { %674 = vst [vmem:[#allocation2 + $0x8] sm:$0xff] %v672_v63 }
 0x133   : > { %986 = vst [vmem:[#allocation3] sm:$0xff] %v984_v0 }
 0x134 PF: > { %v987_v1 = vld [vmem:[%s2294_s11] sm:$0xff]  ;;  %v2143_v5 = vmov 0   ;;  %v2144_v26 = vmov 683565275   ;;  %v2145_v19 = vmov 2475754826  }
 0x135   : > { %2000 = vset.pattern.permute.xlu0 %v2143_v5  ;;  %v2001_v7 = vld [vmem:[%s2300_s14] ss:$0 sm:$0xff]  ;;  %v2146_v2 = vmov 2131351028   ;;  %v2147_v4 = vmov 2102212464  }
 0x136   : > { %991 = vperm.xlu0 %2000, %v987_v1   ;;  %v2148_v29 = vmov 920167782   ;;  %v2149_v55 = vmov 1326507024   ;;  %s1859_s28 = sshll.u32 %s2114_s21, 7  ;;  %p1861_p8 = scmp.ne.s32.totalorder %s2114_s21, 1 }
 0x137   : > { %s2594_s29 = sshra.s32 %s1859_s28, 7 }
 0x138   : > { %s1860_s6 = sshll.u32 %s2594_s29, 3 }
 0x139   : > { %s1317_s27 = scalar_lea.vmem [#allocation6], %s1860_s6 }
 0x1a8   : > { %v992_v42 = vpop.permute.xlu0 %991 }
 0x1a9   : > { %v995_v8 = vmul.f32 %v2001_v7, %v992_v42 }
 0x1ab   : > { %v996_v37 = vadd.f32 0.5, %v995_v8 }
 0x1ad   : > { %v997_v9 = vfloor.f32 %v996_v37 }
 0x1af   : > { %v998_v24 = vsub.f32 %v995_v8, %v997_v9 }
 0x1b1   : > { %v2451_v45 = vmul.f32 -6.2831855, %v998_v24 }
 0x1b3   : > { %v1003_v11 = vand.u32 2139095040, %v2451_v45  ;;  %v1000_v51 = vand.u32 2147483647, %v2451_v45  ;;  %vm1002_vm6 = vcmp.lt.s32.totalorder %v2451_v45, 0 }
 0x1b5   : > { %v1004_v12 = vshrl.u32 %v1003_v11, 23  ;;  %v1007_v6 = vand.u32 8388607, %v1000_v51  ;;  %vm1001_vm7 = vcmp.le.f32.partialorder %v1000_v51, 0.7853982 }
 0x1b7   : > { %v1853_v48 = vadd.s32 4294967169, %v1004_v12  ;;  %v1008_v50 = vor.u32 8388608, %v1007_v6 }
 0x1b9   : > { %v1010_v13 = vadd.s32 1, %v1853_v48  ;;  %v2468_v41 = vshll.u32 %v1008_v50, 8 }
 0x1bb   : > { %vm1011_vm10 = vcmp.gt.s32.totalorder %v1010_v13, 0  ;;  %v1049_v33 = vand.u32 65535, %v2468_v41  ;;  %v1050_v53 = vshrl.u32 %v2468_v41, 16 }
 0x1bc   : > { %v1012_v15 = vsel %vm1011_vm10, %v1010_v13, 0 }
 0x1bd   : > { %v1014_v17 = vand.u32 31, %v1012_v15  ;;  %v2459_v18 = vshrl.u32 %v1012_v15, 5 }
 0x1bf   : > { %v2457_v36 = vsub.s32 32, %v1014_v17  ;;  %v1017_v3 = vshll.u32 %v2144_v26, %v1014_v17  ;;  %v1020_v20 = vshll.u32 %v2145_v19, %v1014_v17  ;;  %v1023_v23 = vshll.u32 %v2146_v2, %v1014_v17 }
 0x1c0   : > { %v1026_v27 = vshll.u32 %v2147_v4, %v1014_v17  ;;  %v1029_v31 = vshll.u32 %v2148_v29, %v1014_v17  ;;  %vm1032_vm11 = vcmp.lt.s32.totalorder %v2459_v18, 1  ;;  %vm1035_vm12 = vcmp.lt.s32.totalorder %v2459_v18, 4 }
 0x1c1   : > { %v1018_v21 = vshrl.u32 %v2145_v19, %v2457_v36  ;;  %v1021_v22 = vshrl.u32 %v2146_v2, %v2457_v36  ;;  %v1024_v25 = vshrl.u32 %v2147_v4, %v2457_v36  ;;  %v1027_v30 = vshrl.u32 %v2148_v29, %v2457_v36 }
 0x1c2   : > { %v1030_v38 = vshrl.u32 %v2149_v55, %v2457_v36  ;;  %vm1034_vm13 = vcmp.lt.s32.totalorder %v2459_v18, 3  ;;  %vm1033_vm14 = vcmp.lt.s32.totalorder %v2459_v18, 2  ;;  %v1016_v15 = vshrl.u32 %v2144_v26, %v2457_v36 }
 0x1c3   : > { %v1019_v14 = vor.u32 %v1018_v21, %v1017_v3  ;;  %v1022_v34 = vor.u32 %v1021_v22, %v1020_v20  ;;  %v1025_v35 = vor.u32 %v1024_v25, %v1023_v23  ;;  %v1028_v52 = vor.u32 %v1027_v30, %v1026_v27 }
 0x1c4   : > { %v1031_v40 = vor.u32 %v1030_v38, %v1029_v31 }
 0x1c5   : > { %v1040_v43 = vsel %vm1032_vm11, %v1019_v14, %v1022_v34  ;;  %v1044_v44 = vsel %vm1032_vm11, %v1022_v34, %v1025_v35  ;;  %v1041_v10 = vsel %vm1035_vm12, %v1028_v52, 920167782  ;;  %v1037_v48 = vsel %vm1035_vm12, %v1025_v35, 2102212464 }
 0x1c6   : > { %v1045_v46 = vsel %vm1035_vm12, %v1031_v40, 1326507024  ;;  %v1042_v47 = vsel %vm1034_vm13, %v1025_v35, %v1041_v10  ;;  %v1036_v21 = vsel %vm1032_vm11, %v1016_v15, %v1019_v14  ;;  %v1038_v2 = vsel %vm1034_vm13, %v1022_v34, %v1037_v48 }
 0x1c7   : > { %v1046_v49 = vsel %vm1034_vm13, %v1028_v52, %v1045_v46  ;;  %v1043_v28 = vsel %vm1033_vm14, %v1040_v43, %v1042_v47  ;;  %v1039_v36 = vsel %vm1033_vm14, %v1036_v21, %v1038_v2 }
 0x1c8   : > { %v1047_v32 = vsel %vm1033_vm14, %v1044_v44, %v1046_v49  ;;  %v1073_v57 = vand.u32 65535, %v1043_v28  ;;  %v1074_v58 = vshrl.u32 %v1043_v28, 16  ;;  %v1093_v30 = vmul.u32 %v2468_v41, %v1039_v36 }
 0x1c9   : > { %v1051_v54 = vand.u32 65535, %v1047_v32  ;;  %v1052_v56 = vshrl.u32 %v1047_v32, 16  ;;  %vm1143_vm14 = vweird.f32 %v2451_v45 }
 0x1ca   : > { %v1076_v60 = vmul.u32 %v1074_v58, %v1049_v33  ;;  %v1077_v61 = vmul.u32 %v1073_v57, %v1050_v53  ;;  %v1075_v0 = vmul.u32 %v1073_v57, %v1049_v33  ;;  %v1078_v8 = vmul.u32 %v1074_v58, %v1050_v53 }
 0x1cb   : > { %v1054_v39 = vmul.u32 %v1052_v56, %v1049_v33  ;;  %v1055_v59 = vmul.u32 %v1051_v54, %v1050_v53  ;;  %v1053_v62 = vmul.u32 %v1051_v54, %v1049_v33  ;;  %v1056_v63 = vmul.u32 %v1052_v56, %v1050_v53 }
 0x1cc   : > { %v1079_v1 = vshll.u32 %v1076_v60, 16  ;;  %v1081_v9 = vshll.u32 %v1077_v61, 16  ;;  %v1080_v19 = vshrl.u32 %v1076_v60, 16  ;;  %v1082_v4 = vshrl.u32 %v1077_v61, 16 }
 0x1cd   : > { %v1057_v16 = vshll.u32 %v1054_v39, 16  ;;  %v1059_v7 = vshll.u32 %v1055_v59, 16  ;;  %v1058_v17 = vshrl.u32 %v1054_v39, 16  ;;  %v1060_v22 = vshrl.u32 %v1055_v59, 16 }
 0x1ce   : > { %vm1083_vm0 = vc.u32 %v1075_v0, %v1079_v1  ;;  %v1085_v24 = vadd.s32 %v1079_v1, %v1075_v0 }
 0x1cf   : > { %vm1061_vm15 = vc.u32 %v1053_v62, %v1057_v16  ;;  %v1063_v42 = vadd.s32 %v1057_v16, %v1053_v62  ;;  %v1084_v12 = vsel %vm1083_vm0, 1, %v2143_v5 }
 0x1d0   : > { %v1062_v37 = vsel %vm1061_vm15, 1, %v2143_v5  ;;  %v1086_v6 = vadd.s32 %v1084_v12, %v1078_v8  ;;  %vm1087_vm2 = vc.u32 %v1085_v24, %v1081_v9  ;;  %v1089_v29 = vadd.s32 %v1085_v24, %v1081_v9 }
 0x1d1   : > { %v1064_v11 = vadd.s32 %v1062_v37, %v1056_v63  ;;  %vm1065_vm1 = vc.u32 %v1063_v42, %v1059_v7  ;;  %v1088_v3 = vsel %vm1087_vm2, 1, %v2143_v5 }
 0x1d2   : > { %v1066_v13 = vsel %vm1065_vm1, 1, %v2143_v5  ;;  %v1090_v20 = vadd.s32 %v1088_v3, %v1086_v6 }
 0x1d3   : > { %v1068_v50 = vadd.s32 %v1066_v13, %v1064_v11 }
 0x1d4   : > { %v1091_v25 = vadd.s32 %v1090_v20, %v1080_v19 }
 0x1d5   : > { %v1069_v23 = vadd.s32 %v1068_v50, %v1058_v17 }
 0x1d6   : > { %v1092_v26 = vadd.s32 %v1091_v25, %v1082_v4 }
 0x1d7   : > { %v1070_v27 = vadd.s32 %v1069_v23, %v1060_v22 }
 0x1d8   : > { %v1096_v5 = vadd.s32 1, %v1092_v26 }
 0x1d9   : > { %vm1095_vm3 = vc.u32 %v1070_v27, %v1089_v29  ;;  %v1094_v18 = vadd.s32 %v1089_v29, %v1070_v27 }
 0x1da   : > { %v1097_v31 = vsel %vm1095_vm3, %v1096_v5, %v1092_v26 }
 0x1db   : > { %v1098_v55 = vadd.s32 %v1097_v31, %v1093_v30 }
 0x1dd   : > { %v1099_v38 = vadd.s32 536870912, %v1098_v55 }
 0x1df   : > { %v1100_v14 = vshrl.u32 %v1099_v38, 30  ;;  %v2521_v38 = vld [vmem:[#allocation2 + $0x8] sm:$0xff] }
 0x1e1   : > { %v1101_v35 = vshll.u32 %v1100_v14, 30  ;;  %v1124_v59 = vsub.s32 4, %v1100_v14 }
 0x1e3   : > { %v1102_v34 = vsub.s32 %v1098_v55, %v1101_v35  ;;  %v1125_v63 = vsel %vm1002_vm6, %v1124_v59, %v1100_v14  ;;  %v2523_v14 = vld [vmem:[#allocation3] sm:$0xff] }
 0x1e4   : > { %v1127_v7 = vsel %vm1001_vm7, 0, %v1125_v63 }
 0x1e5   : > { %vm1103_vm4 = vcmp.lt.s32.totalorder %v1102_v34, 0  ;;  %v1104_v52 = vsub.s32 0, %v1102_v34  ;;  %v1298_v24 = vadd.s32 3, %v1127_v7  ;;  %v1144_v13 = vand.u32 3, %v1127_v7 }
 0x1e7   : > { %v1105_v40 = vsel %vm1103_vm4, %v1104_v52, %v1102_v34  ;;  %v1299_v6 = vand.u32 3, %v1298_v24  ;;  %vm1145_vm8 = vcmp.lt.s32.totalorder %v1144_v13, 2  ;;  %vm1146_vm9 = vcmp.eq.s32.totalorder %v1144_v13, 0 }
 0x1e8   : > { %v1106_v43 = vclz %v1105_v40  ;;  %vm1149_vm10 = vcmp.eq.s32.totalorder %v1144_v13, 2 }
 0x1e9   : > { %vm1300_vm11 = vcmp.lt.s32.totalorder %v1299_v6, 2  ;;  %vm1301_vm12 = vcmp.eq.s32.totalorder %v1299_v6, 0  ;;  %vm1304_vm13 = vcmp.eq.s32.totalorder %v1299_v6, 2 }
 0x1ea   : > { %v1854_v44 = vadd.s32 4294967294, %v1106_v43 }
 0x1ec   : > { %vm1855_vm5 = vcmp.lt.s32.totalorder %v1854_v44, 0 }
 0x1ed   : > { %v1109_v10 = vsel %vm1855_vm5, 0, %v1854_v44 }
 0x1ee   : > { %v1110_v46 = vsub.s32 32, %v1109_v10  ;;  %v1114_v47 = vsub.s32 4294967266, %v1109_v10  ;;  %v1111_v49 = vshll.u32 %v1102_v34, %v1109_v10 }
 0x1f0   : > { %v1112_v28 = vshrl.u32 %v1094_v18, %v1110_v46  ;;  %v1115_v32 = vadd.s32 127, %v1114_v47  ;;  %v2531_v46 = vld [vmem:[#allocation2] sm:$0xff]  ;;  %v2533_v47 = vld [vmem:[#allocation3 + $0x8] sm:$0xff] }
 0x1f2   : > { %v1113_v41 = vor.u32 %v1112_v28, %v1111_v49  ;;  %v1116_v33 = vshll.u32 %v1115_v32, 23 }
 0x1f4   : > { %v1117_v53 = vor.u32 4788187, %v1116_v33  ;;  %v1120_v56 = vcvt.s32.f32 %v1113_v41 }
 0x1f6   : > { %v1118_v54 = vand.u32 2147483647, %v1117_v53 }
 0x1f8   : > { %v1121_v57 = vmul.f32 %v1120_v56, %v1118_v54 }
 0x1fa   : > { %v1122_v58 = vxor.u32 2147483648, %v1121_v57 }
 0x1fc   : > { %v1123_v39 = vsel %vm1002_vm6, %v1122_v58, %v1121_v57 }
 0x1fd   : > { %v1126_v60 = vsel %vm1001_vm7, %v2451_v45, %v1123_v39 }
 0x1fe   : > { %v1128_v61 = vmul.f32 %v1126_v60, %v1126_v60 }
 0x200   : > { %v1129_v62 = vmul.f32 -0.001358992, %v1128_v61  ;;  %v1136_v16 = vmul.f32 -0.00019511016, %v1128_v61 }
 0x202   : > { %v1130_v0 = vadd.f32 0.041655596, %v1129_v62  ;;  %v1137_v1 = vadd.f32 0.008332121, %v1136_v16 }
 0x204   : > { %v1131_v42 = vmul.f32 %v1130_v0, %v1128_v61  ;;  %v1138_v8 = vmul.f32 %v1137_v1, %v1128_v61 }
 0x206   : > { %v1132_v37 = vadd.f32 -0.4999988, %v1131_v42  ;;  %v1139_v9 = vadd.f32 -0.16666654, %v1138_v8 }
 0x208   : > { %v1133_v11 = vmul.f32 %v1132_v37, %v1128_v61  ;;  %v1140_v12 = vmul.f32 %v1139_v9, %v1128_v61 }
 0x20a   : > { %v1134_v48 = vadd.f32 1.0, %v1133_v11  ;;  %v1141_v51 = vadd.f32 1.0, %v1140_v12 }
 0x20c   : > { %v1142_v15 = vmul.f32 %v1141_v51, %v1126_v60  ;;  %v1150_v17 = vxor.u32 2147483648, %v1134_v48 }
 0x20e   : > { %v1147_v50 = vxor.u32 2147483648, %v1142_v15  ;;  %v1151_v19 = vsel %vm1149_vm10, %v1150_v17, %v1142_v15  ;;  %v1306_v21 = vsel %vm1304_vm13, %v1150_v17, %v1142_v15 }
 0x210   : > { %v1148_v3 = vsel %vm1146_vm9, %v1134_v48, %v1147_v50  ;;  %v1303_v20 = vsel %vm1301_vm12, %v1134_v48, %v1147_v50 }
 0x211   : > { %v1152_v2 = vsel %vm1145_vm8, %v1148_v3, %v1151_v19  ;;  %v1307_v22 = vsel %vm1300_vm11, %v1303_v20, %v1306_v21 }
 0x212   : > { %v2511_v23 = vsel %vm1143_vm14, nan, %v1152_v2  ;;  %v2513_v4 = vsel %vm1143_vm14, nan, %v1307_v22 }
 0x213   : > { %v1331_v25 = vrot.slane %v2511_v23, 7  ;;  %v1371_v27 = vrot.slane %v2513_v4, 7  ;;  %v1330_v29 = vrot.slane %v2511_v23, 6  ;;  %v1370_v36 = vrot.slane %v2513_v4, 6 }
 0x214   : > { %v1329_v26 = vrot.slane %v2511_v23, 5  ;;  %v1369_v5 = vrot.slane %v2513_v4, 5  ;;  %v1328_v52 = vrot.slane %v2511_v23, 4  ;;  %v1368_v40 = vrot.slane %v2513_v4, 4 }
 0x215   : > { %v1339_v30 = vperm.slane %v1331_v25, 0  ;;  %v1379_v45 = vperm.slane %v1371_v27, 0  ;;  %v1338_v31 = vperm.slane %v1330_v29, 0  ;;  %v1378_v55 = vperm.slane %v1370_v36, 0 }
 0x216   : > { %v1337_v35 = vperm.slane %v1329_v26, 0  ;;  %v1377_v34 = vperm.slane %v1369_v5, 0  ;;  %v1336_v59 = vperm.slane %v1328_v52, 0  ;;  %v1327_v16 = vrot.slane %v2511_v23, 3 }
 0x217   : > { %v1363_v43 = vmul.f32 %v1339_v30, %v2521_v38  ;;  %v1403_v44 = vmul.f32 %v1379_v45, %v2523_v14  ;;  %v1488_v10 = vmul.f32 %v1339_v30, %v2523_v14  ;;  %v1504_v18 = vmul.f32 %v1379_v45, %v2521_v38 }
 0x218   : > { %v1362_v49 = vmul.f32 %v1339_v30, %v2531_v46  ;;  %v1402_v28 = vmul.f32 %v1379_v45, %v2533_v47  ;;  %v1487_v32 = vmul.f32 %v1339_v30, %v2533_v47  ;;  %v1503_v41 = vmul.f32 %v1379_v45, %v2531_v46 }
 0x219   : > { %v1419_v33 = vsub.f32 %v1363_v43, %v1403_v44  ;;  %v1520_v53 = vadd.f32 %v1504_v18, %v1488_v10  ;;  %v1361_v54 = vmul.f32 %v1338_v31, %v2521_v38  ;;  %v1401_v56 = vmul.f32 %v1378_v55, %v2523_v14 }
 0x21a   : > { %v1418_v57 = vsub.f32 %v1362_v49, %v1402_v28  ;;  %v1486_v58 = vmul.f32 %v1338_v31, %v2523_v14  ;;  %v1502_v39 = vmul.f32 %v1378_v55, %v2521_v38  ;;  %v1519_v60 = vadd.f32 %v1503_v41, %v1487_v32 }
 0x21b   : > { %1426 = vmatpush.msra.mxu0 %v1419_v33  ;;  %1867 = vmatpush.msra.mxu2 %v1419_v33  ;;  %v1360_v61 = vmul.f32 %v1338_v31, %v2531_v46  ;;  %v1400_v62 = vmul.f32 %v1378_v55, %v2533_v47  ;;  %v1417_v63 = vsub.f32 %v1361_v54, %v1401_v56  ;;  %v1376_v7 = vperm.slane %v1368_v40, 0 }
 0x21c   : > { %1527 = vmatpush.msra.mxu1 %v1520_v53  ;;  %1883 = vmatpush.msra.mxu3 %v1520_v53  ;;  %v1485_v0 = vmul.f32 %v1338_v31, %v2533_v47  ;;  %v1501_v1 = vmul.f32 %v1378_v55, %v2531_v46  ;;  %v1518_v42 = vadd.f32 %v1502_v39, %v1486_v58  ;;  %v1367_v9 = vrot.slane %v2513_v4, 3 }
 0x21d   : > { %1427 = vmatpush.msra.mxu0 %v1418_v57  ;;  %1868 = vmatpush.msra.mxu2 %v1418_v57  ;;  %v1359_v8 = vmul.f32 %v1337_v35, %v2521_v38  ;;  %v1399_v37 = vmul.f32 %v1377_v34, %v2523_v14  ;;  %v1416_v24 = vsub.f32 %v1360_v61, %v1400_v62  ;;  %v1335_v48 = vperm.slane %v1327_v16, 0 }
 0x21e   : > { %1528 = vmatpush.msra.mxu1 %v1519_v60  ;;  %1884 = vmatpush.msra.mxu3 %v1519_v60  ;;  %v1484_v11 = vmul.f32 %v1337_v35, %v2523_v14  ;;  %v1500_v12 = vmul.f32 %v1377_v34, %v2521_v38  ;;  %v1517_v51 = vadd.f32 %v1501_v1, %v1485_v0  ;;  %v1326_v15 = vrot.slane %v2511_v23, 2 }
 0x21f   : > { %1428 = vmatpush.msra.mxu0 %v1417_v63  ;;  %1869 = vmatpush.msra.mxu2 %v1417_v63  ;;  %v1358_v13 = vmul.f32 %v1337_v35, %v2531_v46  ;;  %v1398_v6 = vmul.f32 %v1377_v34, %v2533_v47  ;;  %v1415_v17 = vsub.f32 %v1359_v8, %v1399_v37  ;;  %v1366_v19 = vrot.slane %v2513_v4, 2 }
 0x220   : > { %1529 = vmatpush.msra.mxu1 %v1518_v42  ;;  %1885 = vmatpush.msra.mxu3 %v1518_v42  ;;  %v1483_v50 = vmul.f32 %v1337_v35, %v2533_v47  ;;  %v1499_v3 = vmul.f32 %v1377_v34, %v2531_v46  ;;  %v1516_v20 = vadd.f32 %v1500_v12, %v1484_v11  ;;  %v1375_v22 = vperm.slane %v1367_v9, 0 }
 0x221   : > { %1429 = vmatpush.msra.mxu0 %v1416_v24  ;;  %1870 = vmatpush.msra.mxu2 %v1416_v24  ;;  %v1357_v21 = vmul.f32 %v1336_v59, %v2521_v38  ;;  %v1397_v2 = vmul.f32 %v1376_v7, %v2523_v14  ;;  %v1414_v25 = vsub.f32 %v1358_v13, %v1398_v6  ;;  %v1334_v30 = vperm.slane %v1326_v15, 0 }
 0x222   : > { %1530 = vmatpush.msra.mxu1 %v1517_v51  ;;  %1886 = vmatpush.msra.mxu3 %v1517_v51  ;;  %v1482_v27 = vmul.f32 %v1336_v59, %v2523_v14  ;;  %v1498_v29 = vmul.f32 %v1376_v7, %v2521_v38  ;;  %v1515_v36 = vadd.f32 %v1499_v3, %v1483_v50  ;;  %v1374_v55 = vperm.slane %v1366_v19, 0 }
 0x223   : > { %1430 = vmatpush.msra.mxu0 %v1415_v17  ;;  %1871 = vmatpush.msra.mxu2 %v1415_v17  ;;  %v1356_v26 = vmul.f32 %v1336_v59, %v2531_v46  ;;  %v1396_v5 = vmul.f32 %v1376_v7, %v2533_v47  ;;  %v1481_v45 = vmul.f32 %v1336_v59, %v2533_v47  ;;  %v1325_v35 = vrot.slane %v2511_v23, 1 }
 0x224   : > { %1531 = vmatpush.msra.mxu1 %v1516_v20  ;;  %1887 = vmatpush.msra.mxu3 %v1516_v20  ;;  %v1497_v31 = vmul.f32 %v1376_v7, %v2531_v46  ;;  %v1413_v34 = vsub.f32 %v1357_v21, %v1397_v2  ;;  %v1355_v52 = vmul.f32 %v1335_v48, %v2521_v38  ;;  %v1365_v43 = vrot.slane %v2513_v4, 1 }
 0x225   : > { %1431 = vmatpush.msra.mxu0 %v1414_v25  ;;  %1872 = vmatpush.msra.mxu2 %v1414_v25  ;;  %v1395_v40 = vmul.f32 %v1375_v22, %v2523_v14  ;;  %v1514_v44 = vadd.f32 %v1498_v29, %v1482_v27  ;;  %v1480_v10 = vmul.f32 %v1335_v48, %v2523_v14  ;;  %v1333_v54 = vperm.slane %v1325_v35, 0  ;;  %v1420_v35 = vld [vmem:[#allocation4 + $0x8] sm:$0xff] }
 0x226   : > { %1532 = vmatpush.msra.mxu1 %v1515_v36  ;;  %1888 = vmatpush.msra.mxu3 %v1515_v36  ;;  %v1496_v18 = vmul.f32 %v1375_v22, %v2521_v38  ;;  %v1412_v49 = vsub.f32 %v1356_v26, %v1396_v5  ;;  %v1354_v28 = vmul.f32 %v1335_v48, %v2531_v46  ;;  %v1373_v39 = vperm.slane %v1365_v43, 0 }
 0x227   : > { %1432 = vmatpush.msra.mxu0 %v1413_v34  ;;  %1873 = vmatpush.msra.mxu2 %v1413_v34  ;;  %v1394_v32 = vmul.f32 %v1375_v22, %v2533_v47  ;;  %v1513_v41 = vadd.f32 %v1497_v31, %v1481_v45  ;;  %v1479_v33 = vmul.f32 %v1335_v48, %v2533_v47  ;;  %v1332_v42 = vperm.slane %v2511_v23, 0  ;;  %v1318_v45 = vld [vmem:[%s1317_s27] sm:$0xff]  ;;  %v1323_v31 = vld [vmem:[%s1317_s27 + $0x50] sm:$0xff] }
 0x228   : > { %1533 = vmatpush.msra.mxu1 %v1514_v44  ;;  %1889 = vmatpush.msra.mxu3 %v1514_v44  ;;  %v1495_v53 = vmul.f32 %v1375_v22, %v2531_v46  ;;  %v1411_v56 = vsub.f32 %v1355_v52, %v1395_v40  ;;  %v1353_v57 = vmul.f32 %v1334_v30, %v2521_v38  ;;  %v1372_v24 = vperm.slane %v2513_v4, 0  ;;  %v1521_v34 = vld [vmem:[#allocation5] sm:$0xff] }
 0x229   : > { %1433 = vmatpush.msra.mxu0 %v1412_v49  ;;  %1874 = vmatpush.msra.mxu2 %v1412_v49  ;;  %v1393_v58 = vmul.f32 %v1374_v55, %v2523_v14  ;;  %v1512_v59 = vadd.f32 %v1496_v18, %v1480_v10  ;;  %v1478_v60 = vmul.f32 %v1334_v30, %v2523_v14  ;;  %v1423_v10 = vld [vmem:[#allocation4 + $0x10] sm:$0xff] }
 0x22a   : > { %1534 = vmatpush.msra.mxu1 %v1513_v41  ;;  %1890 = vmatpush.msra.mxu3 %v1513_v41  ;;  %v1494_v61 = vmul.f32 %v1374_v55, %v2521_v38  ;;  %v1410_v62 = vsub.f32 %v1354_v28, %v1394_v32  ;;  %v1352_v16 = vmul.f32 %v1334_v30, %v2531_v46  ;;  %v1524_v18 = vld [vmem:[#allocation5 + $0x20] sm:$0xff] }
 0x22b   : > { %1434 = vmatpush.msra.mxu0 %v1411_v56  ;;  %1875 = vmatpush.msra.mxu2 %v1411_v56  ;;  %v1392_v63 = vmul.f32 %v1374_v55, %v2533_v47  ;;  %v1511_v0 = vadd.f32 %v1495_v53, %v1479_v33  ;;  %v1477_v1 = vmul.f32 %v1334_v30, %v2533_v47  ;;  %v1321_v30 = vld [vmem:[%s1317_s27 + $0x30] sm:$0xff]  ;;  %v1421_v33 = vld [vmem:[#allocation4] sm:$0xff]  ;;  %v1522_v53 = vld [vmem:[#allocation5 + $0x18] sm:$0xff] }
 0x22c   : > { %1535 = vmatpush.msra.mxu1 %v1512_v59  ;;  %1891 = vmatpush.msra.mxu3 %v1512_v59  ;;  %v1493_v7 = vmul.f32 %v1374_v55, %v2531_v46  ;;  %v1409_v8 = vsub.f32 %v1353_v57, %v1393_v58  ;;  %v1351_v37 = vmul.f32 %v1333_v54, %v2521_v38  ;;  %v1320_v55 = vld [vmem:[%s1317_s27 + $0x20] sm:$0xff]  ;;  %v1525_v59 = vld [vmem:[#allocation5 + $0x28] sm:$0xff] }
 0x22d   : > { %1435 = vmatpush.msra.mxu0 %v1410_v62  ;;  %1876 = vmatpush.msra.mxu2 %v1410_v62  ;;  %v1391_v9 = vmul.f32 %v1373_v39, %v2523_v14  ;;  %v1510_v11 = vadd.f32 %v1494_v61, %v1478_v60  ;;  %v1476_v12 = vmul.f32 %v1333_v54, %v2523_v14 }
 0x22e   : > { %1536 = vmatpush.msra.mxu1 %v1511_v0  ;;  %1892 = vmatpush.msra.mxu3 %v1511_v0  ;;  %v1492_v48 = vmul.f32 %v1373_v39, %v2521_v38  ;;  %v1408_v23 = vsub.f32 %v1352_v16, %v1392_v63  ;;  %v1350_v51 = vmul.f32 %v1333_v54, %v2531_v46  ;;  %v1422_v63 = vld [vmem:[#allocation4 + $0x20] sm:$0xff] }
 0x22f   : > { %1436 = vmatpush.msra.mxu0 %v1409_v8  ;;  %1877 = vmatpush.msra.mxu2 %v1409_v8  ;;  %v1390_v13 = vmul.f32 %v1373_v39, %v2533_v47  ;;  %v1509_v4 = vadd.f32 %v1493_v7, %v1477_v1  ;;  %v1475_v6 = vmul.f32 %v1333_v54, %v2533_v47  ;;  %v1523_v0 = vld [vmem:[#allocation5 + $0x10] sm:$0xff] }
 0x230   : > { %1537 = vmatpush.msra.mxu1 %v1510_v11  ;;  %1893 = vmatpush.msra.mxu3 %v1510_v11  ;;  %v1491_v15 = vmul.f32 %v1373_v39, %v2531_v46  ;;  %v1407_v17 = vsub.f32 %v1351_v37, %v1391_v9  ;;  %v1349_v50 = vmul.f32 %v1332_v42, %v2521_v38  ;;  %v1424_v39 = vld [vmem:[#allocation4 + $0x18] sm:$0xff]  ;;  %v1425_v37 = vld [vmem:[#allocation4 + $0x28] sm:$0xff] }
 0x231   : > { %1437 = vmatpush.msra.mxu0 %v1408_v23  ;;  %1878 = vmatpush.msra.mxu2 %v1408_v23  ;;  %v1389_v3 = vmul.f32 %v1372_v24, %v2523_v14  ;;  %v1508_v19 = vadd.f32 %v1492_v48, %v1476_v12  ;;  %v1474_v20 = vmul.f32 %v1332_v42, %v2523_v14  ;;  %v1526_v9 = vld [vmem:[#allocation5 + $0x8] sm:$0xff] }
 0x232   : > { %1538 = vmatpush.msra.mxu1 %v1509_v4  ;;  %1894 = vmatpush.msra.mxu3 %v1509_v4  ;;  %v1490_v21 = vmul.f32 %v1372_v24, %v2521_v38  ;;  %v1406_v2 = vsub.f32 %v1350_v51, %v1390_v13  ;;  %v1348_v22 = vmul.f32 %v1332_v42, %v2531_v46 }
 0x233   : > { %1438 = vmatpush.msra.mxu0 %v1407_v17  ;;  %1879 = vmatpush.msra.mxu2 %v1407_v17  ;;  %v1388_v25 = vmul.f32 %v1372_v24, %v2533_v47  ;;  %v1507_v27 = vadd.f32 %v1491_v15, %v1475_v6  ;;  %v1473_v29 = vmul.f32 %v1332_v42, %v2533_v47  ;;  %v1319_v47 = vld [vmem:[%s1317_s27 + $0x10] sm:$0xff] }
 0x234   : > { %1539 = vmatpush.msra.mxu1 %v1508_v19  ;;  %1895 = vmatpush.msra.mxu3 %v1508_v19  ;;  %v1489_v36 = vmul.f32 %v1372_v24, %v2531_v46  ;;  %v1405_v14 = vsub.f32 %v1349_v50, %v1389_v3  ;;  %v1506_v38 = vadd.f32 %v1490_v21, %v1474_v20  ;;  %v1322_v46 = vld [vmem:[%s1317_s27 + $0x40] sm:$0xff] }
 0x235   : > { %1439 = vmatpush.msra.mxu0 %v1406_v2  ;;  %1880 = vmatpush.msra.mxu2 %v1406_v2  ;;  %v1404_v26 = vsub.f32 %v1348_v22, %v1388_v25 }
 0x236   : > { %1540 = vmatpush.msra.mxu1 %v1507_v27  ;;  %1896 = vmatpush.msra.mxu3 %v1507_v27  ;;  %v1505_v5 = vadd.f32 %v1489_v36, %v1473_v29 }
 0x237   : > { %1440 = vmatpush.msra.mxu0 %v1405_v14  ;;  %1881 = vmatpush.msra.mxu2 %v1405_v14 }
 0x238   : > { %1541 = vmatpush.msra.mxu1 %v1506_v38  ;;  %1897 = vmatpush.msra.mxu3 %v1506_v38 }
 0x239   : > { %1441 = vmatpush.msra.mxu0 %v1404_v26  ;;  %1882 = vmatpush.msra.mxu2 %v1404_v26 }
 0x23a   : > { %1542 = vmatpush.msra.mxu1 %v1505_v5  ;;  %1898 = vmatpush.msra.mxu3 %v1505_v5 }
 0x23b   : > { %1451 = vmatmul.f32.vlgmr.msra.gmra.mxu2 %v1321_v30  ;;  %1552 = vmatmul.f32.vlgmr.msra.gmra.mxu3 %v1321_v30 }
 0x23c   : > { %1442 = vmatmul.f32.vlgmr.msra.gmra.mxu0 %v1318_v45  ;;  %1543 = vmatmul.f32.vlgmr.msra.gmra.mxu1 %v1318_v45 }
 0x243   : > { %1454 = vmatmul.f32.gmra.mxu2 %v1322_v46  ;;  %1555 = vmatmul.f32.gmra.mxu3 %v1322_v46 }
 0x244   : > { %1445 = vmatmul.f32.gmra.mxu0 %v1319_v47  ;;  %1546 = vmatmul.f32.gmra.mxu1 %v1319_v47 }
 0x24b   : > { %1457 = vmatmul.f32.gmra.mxu2 %v1323_v31  ;;  %1558 = vmatmul.f32.gmra.mxu3 %v1323_v31 }
 0x24c   : > { %1448 = vmatmul.f32.gmra.mxu0 %v1320_v55  ;;  %1549 = vmatmul.f32.gmra.mxu1 %v1320_v55 }
 0x2b9   : > { %v1443_v52 = vpop.f32.mrf.mxu0  ;;  %v1544_v40 = vpop.f32.mrf.mxu1 }
 0x2ba   : > { %v1461_v43 = vadd.f32 %v1443_v52, %v1420_v35  ;;  %v1562_v44 = vadd.f32 %v1544_v40, %v1521_v34 }
 0x2bc   : > { %1467 = vst [vmem:[#allocation4 + $0x8] sm:$0xff] %v1461_v43 }
 0x2bd   : > { %1568 = vst [vmem:[#allocation5] sm:$0xff] %v1562_v44 }
 0x2be   : > { %v1452_v49 = vpop.f32.mrf.mxu2  ;;  %v1553_v28 = vpop.f32.mrf.mxu3 }
 0x2bf   : > { %v1464_v32 = vadd.f32 %v1452_v49, %v1423_v10  ;;  %v1565_v41 = vadd.f32 %v1553_v28, %v1524_v18 }
 0x2c1   : > { %1470 = vst [vmem:[#allocation4 + $0x10] sm:$0xff] %v1464_v32  ;;  %v1446_v54 = vpop.f32.mrf.mxu0  ;;  %v1547_v56 = vpop.f32.mrf.mxu1 }
 0x2c2   : > { %1571 = vst [vmem:[#allocation5 + $0x20] sm:$0xff] %v1565_v41  ;;  %v1462_v57 = vadd.f32 %v1446_v54, %v1421_v33  ;;  %v1563_v58 = vadd.f32 %v1547_v56, %v1522_v53 }
 0x2c4   : > { %1468 = vst [vmem:[#allocation4] sm:$0xff] %v1462_v57 }
 0x2c5   : > { %1569 = vst [vmem:[#allocation5 + $0x18] sm:$0xff] %v1563_v58 }
 0x2c6   : > { %v1455_v60 = vpop.f32.mrf.mxu2  ;;  %v1556_v61 = vpop.f32.mrf.mxu3 }
 0x2c7   : > { %v1465_v62 = vadd.f32 %v1455_v60, %v1424_v39  ;;  %v1566_v16 = vadd.f32 %v1556_v61, %v1525_v59 }
 0x2c9   : > { %1471 = vst [vmem:[#allocation4 + $0x18] sm:$0xff] %v1465_v62  ;;  %v1449_v1 = vpop.f32.mrf.mxu0  ;;  %v1550_v7 = vpop.f32.mrf.mxu1 }
 0x2ca   : > { %1572 = vst [vmem:[#allocation5 + $0x28] sm:$0xff] %v1566_v16  ;;  %v1463_v42 = vadd.f32 %v1449_v1, %v1422_v63  ;;  %v1564_v8 = vadd.f32 %v1550_v7, %v1523_v0 }
 0x2cc   : > { %1469 = vst [vmem:[#allocation4 + $0x20] sm:$0xff] %v1463_v42 }
 0x2cd   : > { %1570 = vst [vmem:[#allocation5 + $0x10] sm:$0xff] %v1564_v8 }
 0x2ce   : > { %v1458_v24 = vpop.f32.mrf.mxu2  ;;  %v1559_v11 = vpop.f32.mrf.mxu3  ;;  %1577 = sbr.rel (%p1861_p8) target bundleno = 756 (0x2f4), region = 90 }
 0x2cf   : > { %v1466_v12 = vadd.f32 %v1458_v24, %v1425_v37  ;;  %v1567_v48 = vadd.f32 %v1559_v11, %v1526_v9 }
 0x2d1   : > { %1472 = vst [vmem:[#allocation4 + $0x28] sm:$0xff] %v1466_v12 }
 0x2d2   : > { %1573 = vst [vmem:[#allocation5 + $0x8] sm:$0xff] %v1567_v48 }
 0x2d3   : > { %v1578_v23 = vld [vmem:[#allocation4 + $0x8] sm:$0xff]  ;;  %v1581_v51 = vld [vmem:[#allocation4 + $0x10] sm:$0xff]  ;;  %v1579_v4 = vld [vmem:[#allocation4] sm:$0xff] }
 0x2d4   : > { %v1584_v13 = vld [vmem:[#allocation5] sm:$0xff]  ;;  %v1588_v15 = vld [vmem:[#allocation5 + $0x28] sm:$0xff]  ;;  %v1585_v27 = vld [vmem:[#allocation5 + $0x18] sm:$0xff] }
 0x2d5   : > { %v1587_v6 = vld [vmem:[#allocation5 + $0x20] sm:$0xff]  ;;  %v1593_v17 = vadd.f32 %v1584_v13, %v1581_v51  ;;  %v2612_v19 = vld [vmem:[%s2302_s16 + $0x8] sm:$0x3f]  ;;  %v1591_v29 = vsub.f32 %v1579_v4, %v1588_v15  ;;  %v1580_v34 = vld [vmem:[#allocation4 + $0x20] sm:$0xff] }
 0x2d6   : > { %v1590_v50 = vsub.f32 %v1578_v23, %v1587_v6  ;;  %v2609_v3 = vld [vmem:[%s2302_s16] sm:$0x3f]  ;;  %v1602_v21 = vperm.slane %v2612_v19, 0  ;;  %v1615_v22 = vperm.slane %v2612_v19, 1  ;;  %v1582_v25 = vld [vmem:[#allocation4 + $0x18] sm:$0xff]  ;;  %v1634_v55 = vperm.slane %v2612_v19, 2 }
 0x2d7   : > { %v1599_v20 = vperm.slane %v2609_v3, 0  ;;  %v1609_v2 = vperm.slane %v2609_v3, 1  ;;  %v1631_v36 = vperm.slane %v2609_v3, 2  ;;  %v1641_v14 = vperm.slane %v2609_v3, 3  ;;  %v1586_v54 = vld [vmem:[#allocation5 + $0x10] sm:$0xff] }
 0x2d8   : > { %v1603_v26 = vmul.f32 %v1602_v21, %v1593_v17  ;;  %v1616_v30 = vmul.f32 %v1615_v22, %v1593_v17  ;;  %v1594_v45 = vadd.f32 %v1585_v27, %v1582_v25  ;;  %v1647_v35 = vperm.slane %v2612_v19, 3  ;;  %v1583_v53 = vld [vmem:[#allocation4 + $0x28] sm:$0xff] }
 0x2d9   : > { %v1600_v38 = vmul.f32 %v1599_v20, %v1590_v50  ;;  %v1610_v5 = vmul.f32 %v1609_v2, %v1590_v50  ;;  %v1589_v52 = vld [vmem:[#allocation5 + $0x8] sm:$0xff]  ;;  %v1632_v43 = vmul.f32 %v1631_v36, %v1591_v29  ;;  %v1642_v44 = vmul.f32 %v1641_v14, %v1591_v29 }
 0x2da   : > { %v1618_v31 = vrot.slane %v1616_v30, 4  ;;  %v1605_v10 = vmul.f32 %v1602_v21, %v1590_v50  ;;  %v1607_v18 = vmul.f32 %v1599_v20, %v1593_v17  ;;  %v1621_v49 = vmul.f32 %v1615_v22, %v1590_v50 }
 0x2db   : > { %v1604_v46 = vsub.f32 %v1600_v38, %v1603_v26  ;;  %v1612_v47 = vrot.slane %v1610_v5, 4  ;;  %v1635_v32 = vmul.f32 %v1634_v55, %v1594_v45  ;;  %v1648_v41 = vmul.f32 %v1647_v35, %v1594_v45 }
 0x2dc   : > { %v1626_v33 = vmul.f32 %v1609_v2, %v1593_v17  ;;  %v1592_v56 = vsub.f32 %v1580_v34, %v1589_v52  ;;  %v1663_v57 = vperm.slane %v2609_v3, 4  ;;  %v1608_v58 = vadd.f32 %v1607_v18, %v1605_v10 }
 0x2dd   : > { %v1614_v40 = vadd.f32 %v1612_v47, %v1604_v46  ;;  %v1623_v39 = vrot.slane %v1621_v49, 4  ;;  %v1644_v60 = vrot.slane %v1642_v44, 4  ;;  %v1673_v61 = vperm.slane %v2609_v3, 5 }
 0x2de   : > { %v1628_v62 = vrot.slane %v1626_v33, 4  ;;  %v1637_v63 = vmul.f32 %v1634_v55, %v1591_v29  ;;  %v1653_v0 = vmul.f32 %v1647_v35, %v1591_v29  ;;  %v1595_v1 = vadd.f32 %v1586_v54, %v1583_v53 }
 0x2df   : > { %v1620_v28 = vsub.f32 %v1614_v40, %v1618_v31  ;;  %v1625_v16 = vadd.f32 %v1623_v39, %v1608_v58  ;;  %v1650_v42 = vrot.slane %v1648_v41, 4  ;;  %v1666_v8 = vperm.slane %v2612_v19, 4 }
 0x2e0   : > { %v1639_v9 = vmul.f32 %v1631_v36, %v1594_v45  ;;  %v1658_v24 = vmul.f32 %v1641_v14, %v1594_v45  ;;  %v1664_v12 = vmul.f32 %v1663_v57, %v1592_v56  ;;  %v1674_v48 = vmul.f32 %v1673_v61, %v1592_v56 }
 0x2e1   : > { %v1633_v59 = vadd.f32 %v1632_v43, %v1620_v28  ;;  %v1630_v37 = vadd.f32 %v1628_v62, %v1625_v16  ;;  %v1679_v23 = vperm.slane %v2612_v19, 5  ;;  %v1655_v13 = vrot.slane %v1653_v0, 4 }
 0x2e2   : > { %v1667_v6 = vmul.f32 %v1666_v8, %v1595_v1  ;;  %v1660_v50 = vrot.slane %v1658_v24, 4  ;;  %v1676_v20 = vrot.slane %v1674_v48, 4  ;;  %v1669_v2 = vmul.f32 %v1666_v8, %v1592_v56 }
 0x2e3   : > { %v1636_v7 = vsub.f32 %v1633_v59, %v1635_v32  ;;  %v1638_v51 = vadd.f32 %v1637_v63, %v1630_v37  ;;  %v1680_v15 = vmul.f32 %v1679_v23, %v1595_v1  ;;  %v1685_v22 = vmul.f32 %v1679_v23, %v1592_v56 }
 0x2e4   : > { %v1671_v36 = vmul.f32 %v1663_v57, %v1595_v1  ;;  %v1690_v14 = vmul.f32 %v1673_v61, %v1595_v1 }
 0x2e5   : > { %v1646_v11 = vadd.f32 %v1644_v60, %v1636_v7  ;;  %v1640_v17 = vadd.f32 %v1639_v9, %v1638_v51  ;;  %v1682_v27 = vrot.slane %v1680_v15, 4  ;;  %v1687_v26 = vrot.slane %v1685_v22, 4 }
 0x2e6   : > { %v1692_v45 = vrot.slane %v1690_v14, 4 }
 0x2e7   : > { %v1652_v4 = vsub.f32 %v1646_v11, %v1650_v42  ;;  %v1657_v21 = vadd.f32 %v1655_v13, %v1640_v17 }
 0x2e9   : > { %v1665_v3 = vadd.f32 %v1664_v12, %v1652_v4  ;;  %v1662_v29 = vadd.f32 %v1660_v50, %v1657_v21 }
 0x2eb   : > { %v1668_v25 = vsub.f32 %v1665_v3, %v1667_v6  ;;  %v1670_v38 = vadd.f32 %v1669_v2, %v1662_v29 }
 0x2ed   : > { %v1678_v19 = vadd.f32 %v1676_v20, %v1668_v25  ;;  %v1672_v30 = vadd.f32 %v1671_v36, %v1670_v38 }
 0x2ef   : > { %v1684_v5 = vsub.f32 %v1678_v19, %v1682_v27  ;;  %v1689_v46 = vadd.f32 %v1687_v26, %v1672_v30 }
 0x2f1   : > { %1695 = vst [vmem:[%s2304_s4] sm:$0xf] %v1684_v5  ;;  %v1694_v47 = vadd.f32 %v1692_v45, %v1689_v46 }
 0x2f3   : > { %1696 = vst [vmem:[%s2304_s4 + $0x4] sm:$0xf] %v1694_v47 }
 0x2f4 PF: > { %s1864_s21 = sshll.u32 %s2118_s22, 3  ;;  %s1710_s9 = sshll.u32 %s2304_s4, 4  ;;  %s1711_s9 = int_to_ptr.vmem [resolvable:$true] %s1710_s9 }
 0x2f5   : > { %s1708_s30 = scalar_lea.hbm %s2677_s5, %s1864_s21  ;;  %s1698_s14 = scalar_lea.sflag [#allocation8], %s2284_s0 }
 0x2f6   : > { %s1712_s13 = sshll.u32 %s1708_s30, 4  ;;  %s2052_s22 = scalar_lea.hbm %s2677_s5, 16  ;;  %s1713_s13 = int_to_ptr.hbm [resolvable:$true] %s1712_s13 }
 0x2f7   : > { %s2046_s16 = sshra.s32 %s1713_s13, 4  ;;  %s2047_s16 = int_to_ptr.hbm [resolvable:$true] %s2046_s16 }
 0x2f8   : > { %s2048_s10 = scalar_lea.hbm %s2047_s16, 8  ;;  %p2053_p13 = scmp.lt.s32.totalorder %s2047_s16, %s2677_s5 }
 0x2f9   : > { %p2049_p10 = scmp.ne.s32.totalorder %s2047_s16, %s2048_s10  ;;  %p2054_p0 = scmp.lt.s32.totalorder %s2052_s22, %s2048_s10 }
 0x2fb   : > { %p2050_p11 = pnand %p2049_p10, %p2237_p7  ;;  %p2055_p1 = por %p2054_p0, %p2053_p13 }
 0x2fd   : > { %p2051_p12 = pneg %p2050_p11 }
 0x2ff   : > { %p2056_p2 = pnand %p2055_p1, %p2051_p12 }
 0x301   : > { %2059 = shalt.err (!%p2056_p2)
}
 0x302   : > { %1903 = dma.vmem_to_hbm [thread:$0]  (%p2237_p7), %s1711_s9, 128, %s1713_s13, %s1698_s14  }
 0x303 PF: > { %p1915_p4 = scmp.ge.s32.totalorder %s2130_s25, 2  ;;  %s1724_s4 = sand.u32 1, %s2102_s18  }
 0x304   : > { %s1725_s0 = scalar_lea.sflag [#allocation8], %s1724_s4 }
 0x305   : > { %p1910_p3 = pnand %p1915_p4, %p2243_p9 }
 0x307   : > { %p1911_p5 = pneg %p1910_p3 }
 0x309   : > { %2097 = dma.done.wait (%p1911_p5), %s1725_s0, 128  }
 0x30a   : > { %2099 = vsyncadd (%p1911_p5), %s1725_s0, 4294967168  ;;  %s19_s25 = sadd.s32 1, %s2130_s25   ;;  %s2690_s7 = sld [smem:[#allocation13_spill]] }
 0x30b   : > { %p16_p6 = scmp.ge.s32.totalorder %s19_s25, 6   ;;  %s2691_s6 = sld [smem:[#allocation14_spill]] }
 0x30c   : > { %s2692_s18 = smov %s2106_s19  ;;  %s2693_s19 = smov %s2110_s20 }
 0x30d   : > { %s2694_s20 = smov %s2260_s12  ;;  %s2695_s21 = smov %s2122_s23 }
 0x30e   : > { %s2696_s22 = smov %s2126_s24  ;;  %18 = sbr.rel (!%p16_p6) target bundleno = 9 (0x9), region = 139 }
 0x310   : > { %s2697_s23 = smov %s2690_s7 }
 0x311   : > { %s2698_s24 = smov %s2691_s6 }
 0x313   :  { %1731 = vsyncpa [#allocation7], 1 }
 0x314   :  { %1733 = vsyncpa [#allocation7 + $0x1], 1 }
 0x315   :  { %1734 = vsyncpa [#allocation8], 1 }
 0x316   :  { %1736 = vsyncpa [#allocation8 + $0x1], 1 }

</bundles_post_ra>
